<compile_context>
chip_gen: v5e
topology: v5e:2x2
jax: 0.10.0
libtpu: 0.0.40
codegen_flags: <defaults>
</compile_context>

<pallas_src>
import functools

import jax
import jax.numpy as jnp
from jax import lax
from jax.experimental import pallas as pl
from jax.experimental.pallas import tpu as pltpu


# ----------------------------------------------------------------------------
# Fused RDB kernel
# ----------------------------------------------------------------------------
def _make_rdb_kernel(G0, G, C, H, W, PAD, nb):
    """Builds the fused kernel.  Ref order:
       x, (w0, b0), ..., (w_{C-1}, b_{C-1}), lff_w, lff_b, out,
       slab (VMEM scratch), patch (VMEM scratch).
    """
    HW = H * W
    LTOT = PAD + HW + PAD          # per-image lane footprint inside the slab
    Ctot = G0 + C * G

    def kernel(*refs):
        x_ref = refs[0]                        # (nb, G0, HW)  input dtype
        lffw_ref = refs[1 + 2 * C]             # (G0, Ctot)    storage dtype
        lffb_ref = refs[2 + 2 * C]             # (G0, 1)       f32
        o_ref = refs[3 + 2 * C]                # (nb, G0, HW)
        slab = refs[4 + 2 * C]                 # (Ctot, nb*LTOT)       storage dtype
        patch = refs[5 + 2 * C]                # (9*(Ctot-G), nb*HW)   storage dtype
        sdt = slab.dtype

        # 1) Zero ONLY the per-image halo bands (zero row-padding for the 3x3
        #    conv).  The interiors are fully overwritten every iteration, so
        #    zeroing them would be pure VPU/vst waste.
        zpad = jnp.zeros((Ctot, PAD), sdt)
        for n in range(nb):
            base = n * LTOT
            slab[:, base:base + PAD] = zpad
            slab[:, base + PAD + HW:base + LTOT] = zpad

        # 2) Input channels -> slab interiors (lane-dense, 128-aligned starts).
        for n in range(nb):
            s = n * LTOT + PAD
            slab[0:G0, s:s + HW] = x_ref[n].astype(sdt)

        # Column-edge masks (hoisted; shared by every layer / image).  The
        # flat-spatial layout makes a +-1 column tap wrap into the neighboring
        # row, so those output columns must be forced to the zero-pad value.
        col = lax.broadcasted_iota(jnp.int32, (1, HW), 1) % W
        mask_l = col != 0          # kill dx = -1 tap at x == 0
        mask_r = col != W - 1      # kill dx = +1 tap at x == W-1

        def im2col_append(ch_lo, n_ch, row_base):
            """Append the 9 shifted taps of slab channels [ch_lo, ch_lo+n_ch)
            into patch rows [row_base, row_base + 9*n_ch): tap-major within the
            group, per-image lane segments.  Direct stores, no concatenate."""
            for t in range(9):
                ky, kx = divmod(t, 3)
                for n in range(nb):
                    start = n * LTOT + PAD + (ky - 1) * W + (kx - 1)
                    win = slab[ch_lo:ch_lo + n_ch, start:start + HW]
                    if kx == 0:
                        win = jnp.where(mask_l, win, jnp.zeros_like(win))
                    elif kx == 2:
                        win = jnp.where(mask_r, win, jnp.zeros_like(win))
                    patch[row_base + t * n_ch:row_base + (t + 1) * n_ch,
                          n * HW:(n + 1) * HW] = win

        # 3) im2col rows for the input group (done once; never redone).
        im2col_append(0, G0, 0)

        # 4) The C dense conv layers: one deep-K MXU matmul each
        #    (contraction depth 9*cin, Nb*HW lanes).
        for c in range(C):
            cin = G0 + c * G
            w_ref = refs[1 + 2 * c]            # (G, 9*cin)  storage dtype
            b_ref = refs[2 + 2 * c]            # (G, 1)      f32
            acc = jnp.dot(w_ref[...], patch[0:9 * cin, :],
                          preferred_element_type=jnp.float32)   # (G, nb*HW) f32
            acc = jnp.maximum(acc + b_ref[...], 0.0)             # bias+ReLU in f32
            # Channel "concat": write the new G channels at their offset.
            for n in range(nb):
                s = n * LTOT + PAD
                slab[cin:cin + G, s:s + HW] = \
                    acc[:, n * HW:(n + 1) * HW].astype(sdt)
            # Incremental im2col: only the new G channels, only if needed.
            if c + 1 < C:
                im2col_append(cin, G, 9 * cin)

        # 5) Local feature fusion (1x1 conv) + residual.  Residual uses the
        #    original f32 input block (exact even under bf16 storage).
        lffw = lffw_ref[...]
        for n in range(nb):
            s = n * LTOT + PAD
            feat_n = slab[:, s:s + HW]                       # (Ctot, HW) aligned
            y_n = jnp.dot(lffw, feat_n, preferred_element_type=jnp.float32)
            y_n = y_n + lffb_ref[...] + x_ref[n].astype(jnp.float32)
            o_ref[n] = y_n.astype(o_ref.dtype)               # lane-dense store

    return kernel


# ----------------------------------------------------------------------------
# Weight packing: group-blocked, tap-major within each group (matches patch).
# ----------------------------------------------------------------------------
def _pack_conv_weight(w_hwio, G0, G, layer_idx):
    """(3,3,cin,G) HWIO -> (G, 9*cin) with contraction ordered as
    [group0: 9 taps x G0 ch, group1: 9 taps x G ch, ...]."""
    G_out = w_hwio.shape[-1]
    sizes = [G0] + [G] * layer_idx
    pieces, start = [], 0
    for sz in sizes:
        wg = w_hwio[:, :, start:start + sz, :]                  # (3,3,sz,G)
        wg = jnp.transpose(wg, (3, 0, 1, 2)).reshape(G_out, 9 * sz)
        pieces.append(wg)
        start += sz
    return jnp.concatenate(pieces, axis=1)                      # (G, 9*cin)


# ----------------------------------------------------------------------------
# Wrapper: one pallas_call for the whole RDB
# ----------------------------------------------------------------------------
@functools.partial(jax.jit, static_argnames=("images_per_step", "storage_dtype"))
def rdb_forward(x, params, *, images_per_step=None, storage_dtype=jnp.float32):
    """Fused RDB forward.  x: (N, G0, H, W) NCHW -> (N, G0, H, W)."""
    N, G0, H, W = x.shape
    C = len(params["convs"])
    assert C >= 1
    G = params["convs"][0][0].shape[-1]
    Ctot = G0 + C * G
    HW = H * W
    PAD = 128                      # >= W+1 halo; 128-aligns each image interior
    assert W + 1 <= PAD, "PAD must cover the one-row conv halo"
    LTOT = PAD + HW + PAD

    # Images folded onto the lane axis per grid step: widen matmuls up to
    # ~1024 lanes but keep >=2 grid steps when N allows (v7x: 2 TensorCores).
    if images_per_step is None:
        nb = 1
        for cand in range(1, N + 1):
            if N % cand != 0 or cand * HW > 1024:
                continue
            if N // cand >= 2 or N == 1:
                nb = cand
    else:
        nb = int(images_per_step)
    assert nb >= 1 and N % nb == 0

    sdt = jnp.dtype(storage_dtype)
    x2 = x.reshape(N, G0, HW)      # NCHW -> (N, C, H*W): contiguous reshape

    inputs = [x2]
    in_specs = [pl.BlockSpec((nb, G0, HW), lambda i: (i, 0, 0))]
    flops = 0
    for c, (w_hwio, b) in enumerate(params["convs"]):
        cin = G0 + c * G
        wcat = _pack_conv_weight(w_hwio, G0, G, c).astype(sdt)   # (G, 9*cin)
        inputs += [wcat, b.reshape(G, 1).astype(jnp.float32)]
        in_specs += [pl.BlockSpec((G, 9 * cin), lambda i: (0, 0)),
                     pl.BlockSpec((G, 1), lambda i: (0, 0))]
        flops += 2 * 9 * cin * G * HW
    lffw = params["lff_w"].T.astype(sdt)                         # (G0, Ctot)
    lffb = params["lff_b"].reshape(G0, 1).astype(jnp.float32)
    inputs += [lffw, lffb]
    in_specs += [pl.BlockSpec((G0, Ctot), lambda i: (0, 0)),
                 pl.BlockSpec((G0, 1), lambda i: (0, 0))]
    flops += 2 * Ctot * G0 * HW
    flops *= N

    # Scratch sizes & VMEM budget (slab + patch + double-buffered I/O + weights).
    patch_rows = 9 * (G0 + (C - 1) * G)
    slab_bytes = Ctot * nb * LTOT * sdt.itemsize
    patch_bytes = patch_rows * nb * HW * sdt.itemsize
    io_bytes = 2 * 2 * nb * G0 * HW * x.dtype.itemsize
    w_bytes = 2 * sum(int(a.size) * a.dtype.itemsize for a in inputs[1:])
    vmem_limit = int(1.5 * (slab_bytes + patch_bytes + io_bytes + w_bytes))
    vmem_limit = max(16 << 20, min(vmem_limit + (4 << 20), 64 << 20))

    bytes_accessed = (int(x2.size) * x2.dtype.itemsize
                      + N * G0 * HW * x.dtype.itemsize
                      + (N // nb) * sum(int(a.size) * a.dtype.itemsize
                                        for a in inputs[1:]))

    out = pl.pallas_call(
        _make_rdb_kernel(G0, G, C, H, W, PAD, nb),
        out_shape=jax.ShapeDtypeStruct((N, G0, HW), x.dtype),
        grid_spec=pltpu.PrefetchScalarGridSpec(
            num_scalar_prefetch=0,
            grid=(N // nb,),
            in_specs=in_specs,
            out_specs=pl.BlockSpec((nb, G0, HW), lambda i: (i, 0, 0)),
            scratch_shapes=[pltpu.VMEM((Ctot, nb * LTOT), sdt),
                            pltpu.VMEM((patch_rows, nb * HW), sdt)],
        ),
        compiler_params=pltpu.CompilerParams(
            dimension_semantics=("parallel",),
            vmem_limit_bytes=vmem_limit,
        ),
        cost_estimate=pl.CostEstimate(flops=int(flops), transcendentals=0,
                                      bytes_accessed=int(bytes_accessed)),
        input_output_aliases={0: 0},   # out reuses x2's HBM buffer
    )(*inputs)
    return out.reshape(N, G0, H, W)


# ----------------------------------------------------------------------------
# Synthetic parameters + plain-JAX reference (for the correctness check)
# ----------------------------------------------------------------------------
def init_rdb_params(key, G0, G, C, k_size=3):
    params = {"convs": []}
    for c in range(C):
        cin = G0 + c * G
        key, kw, kb = jax.random.split(key, 3)
        # PyTorch Conv2d weight (G, cin, k, k) stored here as HWIO (k,k,cin,G).
        w = 0.05 * jax.random.normal(kw, (k_size, k_size, cin, G), jnp.float32)
        b = 0.05 * jax.random.normal(kb, (G,), jnp.float32)
        params["convs"].append((w, b))
    key, kw, kb = jax.random.split(key, 3)
    Ctot = G0 + C * G
    params["lff_w"] = 0.05 * jax.random.normal(kw, (Ctot, G0), jnp.float32)
    params["lff_b"] = 0.05 * jax.random.normal(kb, (G0,), jnp.float32)
    return params


def rdb_reference(x_nchw, params):
    x = jnp.transpose(x_nchw, (0, 2, 3, 1))
    feat = x
    dn = ("NHWC", "HWIO", "NHWC")
    for (w, b) in params["convs"]:
        out = lax.conv_general_dilated(feat, w, (1, 1), "SAME",
                                       dimension_numbers=dn)
        out = jnp.maximum(out + b, 0.0)
        feat = jnp.concatenate([feat, out], axis=-1)
    Ctot, G0 = params["lff_w"].shape
    w1 = params["lff_w"].reshape(1, 1, Ctot, G0)
    y = lax.conv_general_dilated(feat, w1, (1, 1), "SAME",
                                 dimension_numbers=dn) + params["lff_b"]
    y = y + x
    return jnp.transpose(y, (0, 3, 1, 2))


if __name__ == "__main__":
    # Small shapes (NCHW like PyTorch): batch=4 so the kernel exercises both
    # lane-widening (2 images / grid step -> 512-lane matmuls) and >=2 grid
    # steps (keeps both v7x TensorCores busy).
    N, G0, G, C, H, W = 4, 8, 8, 3, 16, 16
    key = jax.random.PRNGKey(0)
    key, kx = jax.random.split(key)
    x = jax.random.normal(kx, (N, G0, H, W), jnp.float32)
    params = init_rdb_params(key, G0, G, C)

    ref = rdb_reference(x, params)

    # f32 storage path: exact match with the f32 reference.
    out = jax.block_until_ready(rdb_forward(x, params))
    assert out.shape == (N, G0, H, W)
    assert jnp.allclose(out, ref, atol=1e-3, rtol=1e-3), "f32 mismatch vs reference"

    # bf16 storage path (v6e/v7x perf option): f32 accumulation, looser tolerance.
    out_bf16 = jax.block_until_ready(
        rdb_forward(x, params, storage_dtype=jnp.bfloat16))
    assert jnp.allclose(out_bf16, ref, atol=5e-2, rtol=5e-2), "bf16 mismatch vs reference"

    print("KERNEL_OK")
</pallas_src>

<mosaic_0001>
module attributes {stable_mosaic.version = 11 : i64} {
  func.func @kernel(%arg0: i32, %arg1: memref<2x8x256xf32, #tpu.memory_space<vmem>>, %arg2: memref<8x72xf32, #tpu.memory_space<vmem>>, %arg3: memref<8x1xf32, #tpu.memory_space<vmem>>, %arg4: memref<8x144xf32, #tpu.memory_space<vmem>>, %arg5: memref<8x1xf32, #tpu.memory_space<vmem>>, %arg6: memref<8x216xf32, #tpu.memory_space<vmem>>, %arg7: memref<8x1xf32, #tpu.memory_space<vmem>>, %arg8: memref<8x32xf32, #tpu.memory_space<vmem>>, %arg9: memref<8x1xf32, #tpu.memory_space<vmem>>, %arg10: memref<2x8x256xf32, #tpu.memory_space<vmem>>, %arg11: memref<32x1024xf32, #tpu.memory_space<vmem>>, %arg12: memref<216x512xf32, #tpu.memory_space<vmem>>) attributes {dimension_semantics = [#tpu.dimension_semantics<parallel>], iteration_bounds = array<i64: 2>, scalar_prefetch = 0 : i64, scratch_operands = 2 : i64, tpu.core_type = #tpu.core_type<tc>, window_params = [{transform_indices = @transform_0, window_bounds = array<i64: 2, 8, 256>}, {pipeline_mode = #tpu.pipeline_mode<synchronous>, transform_indices = @transform_1, window_bounds = array<i64: 8, 72>}, {pipeline_mode = #tpu.pipeline_mode<synchronous>, transform_indices = @transform_2, window_bounds = array<i64: 8, 1>}, {pipeline_mode = #tpu.pipeline_mode<synchronous>, transform_indices = @transform_3, window_bounds = array<i64: 8, 144>}, {pipeline_mode = #tpu.pipeline_mode<synchronous>, transform_indices = @transform_4, window_bounds = array<i64: 8, 1>}, {pipeline_mode = #tpu.pipeline_mode<synchronous>, transform_indices = @transform_5, window_bounds = array<i64: 8, 216>}, {pipeline_mode = #tpu.pipeline_mode<synchronous>, transform_indices = @transform_6, window_bounds = array<i64: 8, 1>}, {pipeline_mode = #tpu.pipeline_mode<synchronous>, transform_indices = @transform_7, window_bounds = array<i64: 8, 32>}, {pipeline_mode = #tpu.pipeline_mode<synchronous>, transform_indices = @transform_8, window_bounds = array<i64: 8, 1>}, {transform_indices = @transform_9, window_bounds = array<i64: 2, 8, 256>}]} {
    %cst = arith.constant 0.000000e+00 : f32
    %0 = vector.broadcast %cst : f32 to vector<32x128xf32>
    %c0 = arith.constant 0 : index
    %c0_0 = arith.constant 0 : index
    %1 = vector.load %arg11[%c0, %c0_0] : memref<32x1024xf32, #tpu.memory_space<vmem>>, vector<32x128xf32>
    tpu.vector_store %arg11[%c0, %c0_0], %0 {strides = array<i32>} : memref<32x1024xf32, #tpu.memory_space<vmem>>, vector<32x128xf32>,
    %c0_1 = arith.constant 0 : index
    %c384 = arith.constant 384 : index
    %2 = vector.load %arg11[%c0_1, %c384] : memref<32x1024xf32, #tpu.memory_space<vmem>>, vector<32x128xf32>
    tpu.vector_store %arg11[%c0_1, %c384], %0 {strides = array<i32>} : memref<32x1024xf32, #tpu.memory_space<vmem>>, vector<32x128xf32>,
    %c0_2 = arith.constant 0 : index
    %c512 = arith.constant 512 : index
    %3 = vector.load %arg11[%c0_2, %c512] : memref<32x1024xf32, #tpu.memory_space<vmem>>, vector<32x128xf32>
    tpu.vector_store %arg11[%c0_2, %c512], %0 {strides = array<i32>} : memref<32x1024xf32, #tpu.memory_space<vmem>>, vector<32x128xf32>,
    %c0_3 = arith.constant 0 : index
    %c896 = arith.constant 896 : index
    %4 = vector.load %arg11[%c0_3, %c896] : memref<32x1024xf32, #tpu.memory_space<vmem>>, vector<32x128xf32>
    tpu.vector_store %arg11[%c0_3, %c896], %0 {strides = array<i32>} : memref<32x1024xf32, #tpu.memory_space<vmem>>, vector<32x128xf32>,
    %c0_4 = arith.constant 0 : index
    %c0_5 = arith.constant 0 : index
    %c0_6 = arith.constant 0 : index
    %5 = vector.load %arg1[%c0_4, %c0_5, %c0_6] : memref<2x8x256xf32, #tpu.memory_space<vmem>>, vector<1x8x256xf32>
    %6 = vector.shape_cast %5 : vector<1x8x256xf32> to vector<8x256xf32>
    %c0_7 = arith.constant 0 : index
    %c128 = arith.constant 128 : index
    %7 = vector.load %arg11[%c0_7, %c128] : memref<32x1024xf32, #tpu.memory_space<vmem>>, vector<8x256xf32>
    tpu.vector_store %arg11[%c0_7, %c128], %6 {strides = array<i32>} : memref<32x1024xf32, #tpu.memory_space<vmem>>, vector<8x256xf32>,
    %c1 = arith.constant 1 : index
    %c0_8 = arith.constant 0 : index
    %c0_9 = arith.constant 0 : index
    %8 = vector.load %arg1[%c1, %c0_8, %c0_9] : memref<2x8x256xf32, #tpu.memory_space<vmem>>, vector<1x8x256xf32>
    %9 = vector.shape_cast %8 : vector<1x8x256xf32> to vector<8x256xf32>
    %c0_10 = arith.constant 0 : index
    %c640 = arith.constant 640 : index
    %10 = vector.load %arg11[%c0_10, %c640] : memref<32x1024xf32, #tpu.memory_space<vmem>>, vector<8x256xf32>
    tpu.vector_store %arg11[%c0_10, %c640], %9 {strides = array<i32>} : memref<32x1024xf32, #tpu.memory_space<vmem>>, vector<8x256xf32>,
    %11 = tpu.iota {dimensions = array<i32: 1>} : vector<1x256xi32>
    %c16_i32 = arith.constant 16 : i32
    %c0_i32 = arith.constant 0 : i32
    %12 = arith.cmpi eq, %c16_i32, %c0_i32 : i32
    %c1_i32 = arith.constant 1 : i32
    %13 = arith.select %12, %c1_i32, %c16_i32 : i32
    %14 = vector.broadcast %13 : i32 to vector<1x256xi32>
    %15 = arith.remsi %11, %14 : vector<1x256xi32>
    %c0_i32_11 = arith.constant 0 : i32
    %16 = vector.broadcast %c0_i32_11 : i32 to vector<1x256xi32>
    %17 = arith.cmpi ne, %15, %16 : vector<1x256xi32>
    %c0_i32_12 = arith.constant 0 : i32
    %18 = vector.broadcast %c0_i32_12 : i32 to vector<1x256xi32>
    %19 = arith.cmpi slt, %15, %18 : vector<1x256xi32>
    %c0_i32_13 = arith.constant 0 : i32
    %20 = arith.cmpi slt, %13, %c0_i32_13 : i32
    %21 = vector.broadcast %20 : i1 to vector<1x256xi1>
    %22 = vector.broadcast %21 : vector<1x256xi1> to vector<1x256xi1>
    %23 = arith.xori %19, %22 : vector<1x256xi1>
    %24 = arith.andi %23, %17 : vector<1x256xi1>
    %25 = vector.broadcast %13 : i32 to vector<1x256xi32>
    %26 = arith.addi %15, %25 : vector<1x256xi32>
    %27 = arith.select %24, %26, %15 : vector<1x256xi1>, vector<1x256xi32>
    %c0_i32_14 = arith.constant 0 : i32
    %28 = vector.broadcast %c0_i32_14 : i32 to vector<1x256xi32>
    %29 = arith.cmpi ne, %27, %28 : vector<1x256xi32>
    %c15_i32 = arith.constant 15 : i32
    %30 = vector.broadcast %c15_i32 : i32 to vector<1x256xi32>
    %31 = arith.cmpi ne, %27, %30 : vector<1x256xi32>
    %c0_15 = arith.constant 0 : index
    %c111 = arith.constant 111 : index
    %32 = vector.load %arg11[%c0_15, %c111] : memref<32x1024xf32, #tpu.memory_space<vmem>>, vector<8x256xf32>
    %cst_16 = arith.constant 0.000000e+00 : f32
    %33 = vector.broadcast %cst_16 : f32 to vector<8x256xf32>
    %34 = vector.shape_cast %29 : vector<1x256xi1> to vector<1x256xi1>
    %35 = vector.broadcast %34 : vector<1x256xi1> to vector<8x256xi1>
    %36 = arith.select %35, %32, %33 : vector<8x256xi1>, vector<8x256xf32>
    %c0_17 = arith.constant 0 : index
    %c0_18 = arith.constant 0 : index
    %37 = vector.load %arg12[%c0_17, %c0_18] : memref<216x512xf32, #tpu.memory_space<vmem>>, vector<8x256xf32>
    tpu.vector_store %arg12[%c0_17, %c0_18], %36 {strides = array<i32>} : memref<216x512xf32, #tpu.memory_space<vmem>>, vector<8x256xf32>,
    %c0_19 = arith.constant 0 : index
    %c623 = arith.constant 623 : index
    %38 = vector.load %arg11[%c0_19, %c623] : memref<32x1024xf32, #tpu.memory_space<vmem>>, vector<8x256xf32>
    %cst_20 = arith.constant 0.000000e+00 : f32
    %39 = vector.broadcast %cst_20 : f32 to vector<8x256xf32>
    %40 = vector.shape_cast %29 : vector<1x256xi1> to vector<1x256xi1>
    %41 = vector.broadcast %40 : vector<1x256xi1> to vector<8x256xi1>
    %42 = arith.select %41, %38, %39 : vector<8x256xi1>, vector<8x256xf32>
    %c0_21 = arith.constant 0 : index
    %c256 = arith.constant 256 : index
    %43 = vector.load %arg12[%c0_21, %c256] : memref<216x512xf32, #tpu.memory_space<vmem>>, vector<8x256xf32>
    tpu.vector_store %arg12[%c0_21, %c256], %42 {strides = array<i32>} : memref<216x512xf32, #tpu.memory_space<vmem>>, vector<8x256xf32>,
    %c0_22 = arith.constant 0 : index
    %c112 = arith.constant 112 : index
    %44 = vector.load %arg11[%c0_22, %c112] : memref<32x1024xf32, #tpu.memory_space<vmem>>, vector<8x256xf32>
    %c8 = arith.constant 8 : index
    %c0_23 = arith.constant 0 : index
    %45 = vector.load %arg12[%c8, %c0_23] : memref<216x512xf32, #tpu.memory_space<vmem>>, vector<8x256xf32>
    tpu.vector_store %arg12[%c8, %c0_23], %44 {strides = array<i32>} : memref<216x512xf32, #tpu.memory_space<vmem>>, vector<8x256xf32>,
    %c0_24 = arith.constant 0 : index
    %c624 = arith.constant 624 : index
    %46 = vector.load %arg11[%c0_24, %c624] : memref<32x1024xf32, #tpu.memory_space<vmem>>, vector<8x256xf32>
    %c8_25 = arith.constant 8 : index
    %c256_26 = arith.constant 256 : index
    %47 = vector.load %arg12[%c8_25, %c256_26] : memref<216x512xf32, #tpu.memory_space<vmem>>, vector<8x256xf32>
    tpu.vector_store %arg12[%c8_25, %c256_26], %46 {strides = array<i32>} : memref<216x512xf32, #tpu.memory_space<vmem>>, vector<8x256xf32>,
    %c0_27 = arith.constant 0 : index
    %c113 = arith.constant 113 : index
    %48 = vector.load %arg11[%c0_27, %c113] : memref<32x1024xf32, #tpu.memory_space<vmem>>, vector<8x256xf32>
    %cst_28 = arith.constant 0.000000e+00 : f32
    %49 = vector.broadcast %cst_28 : f32 to vector<8x256xf32>
    %50 = vector.shape_cast %31 : vector<1x256xi1> to vector<1x256xi1>
    %51 = vector.broadcast %50 : vector<1x256xi1> to vector<8x256xi1>
    %52 = arith.select %51, %48, %49 : vector<8x256xi1>, vector<8x256xf32>
    %c16 = arith.constant 16 : index
    %c0_29 = arith.constant 0 : index
    %53 = vector.load %arg12[%c16, %c0_29] : memref<216x512xf32, #tpu.memory_space<vmem>>, vector<8x256xf32>
    tpu.vector_store %arg12[%c16, %c0_29], %52 {strides = array<i32>} : memref<216x512xf32, #tpu.memory_space<vmem>>, vector<8x256xf32>,
    %c0_30 = arith.constant 0 : index
    %c625 = arith.constant 625 : index
    %54 = vector.load %arg11[%c0_30, %c625] : memref<32x1024xf32, #tpu.memory_space<vmem>>, vector<8x256xf32>
    %cst_31 = arith.constant 0.000000e+00 : f32
    %55 = vector.broadcast %cst_31 : f32 to vector<8x256xf32>
    %56 = vector.shape_cast %31 : vector<1x256xi1> to vector<1x256xi1>
    %57 = vector.broadcast %56 : vector<1x256xi1> to vector<8x256xi1>
    %58 = arith.select %57, %54, %55 : vector<8x256xi1>, vector<8x256xf32>
    %c16_32 = arith.constant 16 : index
    %c256_33 = arith.constant 256 : index
    %59 = vector.load %arg12[%c16_32, %c256_33] : memref<216x512xf32, #tpu.memory_space<vmem>>, vector<8x256xf32>
    tpu.vector_store %arg12[%c16_32, %c256_33], %58 {strides = array<i32>} : memref<216x512xf32, #tpu.memory_space<vmem>>, vector<8x256xf32>,
    %c0_34 = arith.constant 0 : index
    %c127 = arith.constant 127 : index
    %60 = vector.load %arg11[%c0_34, %c127] : memref<32x1024xf32, #tpu.memory_space<vmem>>, vector<8x256xf32>
    %cst_35 = arith.constant 0.000000e+00 : f32
    %61 = vector.broadcast %cst_35 : f32 to vector<8x256xf32>
    %62 = vector.shape_cast %29 : vector<1x256xi1> to vector<1x256xi1>
    %63 = vector.broadcast %62 : vector<1x256xi1> to vector<8x256xi1>
    %64 = arith.select %63, %60, %61 : vector<8x256xi1>, vector<8x256xf32>
    %c24 = arith.constant 24 : index
    %c0_36 = arith.constant 0 : index
    %65 = vector.load %arg12[%c24, %c0_36] : memref<216x512xf32, #tpu.memory_space<vmem>>, vector<8x256xf32>
    tpu.vector_store %arg12[%c24, %c0_36], %64 {strides = array<i32>} : memref<216x512xf32, #tpu.memory_space<vmem>>, vector<8x256xf32>,
    %c0_37 = arith.constant 0 : index
    %c639 = arith.constant 639 : index
    %66 = vector.load %arg11[%c0_37, %c639] : memref<32x1024xf32, #tpu.memory_space<vmem>>, vector<8x256xf32>
    %cst_38 = arith.constant 0.000000e+00 : f32
    %67 = vector.broadcast %cst_38 : f32 to vector<8x256xf32>
    %68 = vector.shape_cast %29 : vector<1x256xi1> to vector<1x256xi1>
    %69 = vector.broadcast %68 : vector<1x256xi1> to vector<8x256xi1>
    %70 = arith.select %69, %66, %67 : vector<8x256xi1>, vector<8x256xf32>
    %c24_39 = arith.constant 24 : index
    %c256_40 = arith.constant 256 : index
    %71 = vector.load %arg12[%c24_39, %c256_40] : memref<216x512xf32, #tpu.memory_space<vmem>>, vector<8x256xf32>
    tpu.vector_store %arg12[%c24_39, %c256_40], %70 {strides = array<i32>} : memref<216x512xf32, #tpu.memory_space<vmem>>, vector<8x256xf32>,
    %c0_41 = arith.constant 0 : index
    %c128_42 = arith.constant 128 : index
    %72 = vector.load %arg11[%c0_41, %c128_42] : memref<32x1024xf32, #tpu.memory_space<vmem>>, vector<8x256xf32>
    %c32 = arith.constant 32 : index
    %c0_43 = arith.constant 0 : index
    %73 = vector.load %arg12[%c32, %c0_43] : memref<216x512xf32, #tpu.memory_space<vmem>>, vector<8x256xf32>
    tpu.vector_store %arg12[%c32, %c0_43], %72 {strides = array<i32>} : memref<216x512xf32, #tpu.memory_space<vmem>>, vector<8x256xf32>,
    %c0_44 = arith.constant 0 : index
    %c640_45 = arith.constant 640 : index
    %74 = vector.load %arg11[%c0_44, %c640_45] : memref<32x1024xf32, #tpu.memory_space<vmem>>, vector<8x256xf32>
    %c32_46 = arith.constant 32 : index
    %c256_47 = arith.constant 256 : index
    %75 = vector.load %arg12[%c32_46, %c256_47] : memref<216x512xf32, #tpu.memory_space<vmem>>, vector<8x256xf32>
    tpu.vector_store %arg12[%c32_46, %c256_47], %74 {strides = array<i32>} : memref<216x512xf32, #tpu.memory_space<vmem>>, vector<8x256xf32>,
    %c0_48 = arith.constant 0 : index
    %c129 = arith.constant 129 : index
    %76 = vector.load %arg11[%c0_48, %c129] : memref<32x1024xf32, #tpu.memory_space<vmem>>, vector<8x256xf32>
    %cst_49 = arith.constant 0.000000e+00 : f32
    %77 = vector.broadcast %cst_49 : f32 to vector<8x256xf32>
    %78 = vector.shape_cast %31 : vector<1x256xi1> to vector<1x256xi1>
    %79 = vector.broadcast %78 : vector<1x256xi1> to vector<8x256xi1>
    %80 = arith.select %79, %76, %77 : vector<8x256xi1>, vector<8x256xf32>
    %c40 = arith.constant 40 : index
    %c0_50 = arith.constant 0 : index
    %81 = vector.load %arg12[%c40, %c0_50] : memref<216x512xf32, #tpu.memory_space<vmem>>, vector<8x256xf32>
    tpu.vector_store %arg12[%c40, %c0_50], %80 {strides = array<i32>} : memref<216x512xf32, #tpu.memory_space<vmem>>, vector<8x256xf32>,
    %c0_51 = arith.constant 0 : index
    %c641 = arith.constant 641 : index
    %82 = vector.load %arg11[%c0_51, %c641] : memref<32x1024xf32, #tpu.memory_space<vmem>>, vector<8x256xf32>
    %cst_52 = arith.constant 0.000000e+00 : f32
    %83 = vector.broadcast %cst_52 : f32 to vector<8x256xf32>
    %84 = vector.shape_cast %31 : vector<1x256xi1> to vector<1x256xi1>
    %85 = vector.broadcast %84 : vector<1x256xi1> to vector<8x256xi1>
    %86 = arith.select %85, %82, %83 : vector<8x256xi1>, vector<8x256xf32>
    %c40_53 = arith.constant 40 : index
    %c256_54 = arith.constant 256 : index
    %87 = vector.load %arg12[%c40_53, %c256_54] : memref<216x512xf32, #tpu.memory_space<vmem>>, vector<8x256xf32>
    tpu.vector_store %arg12[%c40_53, %c256_54], %86 {strides = array<i32>} : memref<216x512xf32, #tpu.memory_space<vmem>>, vector<8x256xf32>,
    %c0_55 = arith.constant 0 : index
    %c143 = arith.constant 143 : index
    %88 = vector.load %arg11[%c0_55, %c143] : memref<32x1024xf32, #tpu.memory_space<vmem>>, vector<8x256xf32>
    %cst_56 = arith.constant 0.000000e+00 : f32
    %89 = vector.broadcast %cst_56 : f32 to vector<8x256xf32>
    %90 = vector.shape_cast %29 : vector<1x256xi1> to vector<1x256xi1>
    %91 = vector.broadcast %90 : vector<1x256xi1> to vector<8x256xi1>
    %92 = arith.select %91, %88, %89 : vector<8x256xi1>, vector<8x256xf32>
    %c48 = arith.constant 48 : index
    %c0_57 = arith.constant 0 : index
    %93 = vector.load %arg12[%c48, %c0_57] : memref<216x512xf32, #tpu.memory_space<vmem>>, vector<8x256xf32>
    tpu.vector_store %arg12[%c48, %c0_57], %92 {strides = array<i32>} : memref<216x512xf32, #tpu.memory_space<vmem>>, vector<8x256xf32>,
    %c0_58 = arith.constant 0 : index
    %c655 = arith.constant 655 : index
    %94 = vector.load %arg11[%c0_58, %c655] : memref<32x1024xf32, #tpu.memory_space<vmem>>, vector<8x256xf32>
    %cst_59 = arith.constant 0.000000e+00 : f32
    %95 = vector.broadcast %cst_59 : f32 to vector<8x256xf32>
    %96 = vector.shape_cast %29 : vector<1x256xi1> to vector<1x256xi1>
    %97 = vector.broadcast %96 : vector<1x256xi1> to vector<8x256xi1>
    %98 = arith.select %97, %94, %95 : vector<8x256xi1>, vector<8x256xf32>
    %c48_60 = arith.constant 48 : index
    %c256_61 = arith.constant 256 : index
    %99 = vector.load %arg12[%c48_60, %c256_61] : memref<216x512xf32, #tpu.memory_space<vmem>>, vector<8x256xf32>
    tpu.vector_store %arg12[%c48_60, %c256_61], %98 {strides = array<i32>} : memref<216x512xf32, #tpu.memory_space<vmem>>, vector<8x256xf32>,
    %c0_62 = arith.constant 0 : index
    %c144 = arith.constant 144 : index
    %100 = vector.load %arg11[%c0_62, %c144] : memref<32x1024xf32, #tpu.memory_space<vmem>>, vector<8x256xf32>
    %c56 = arith.constant 56 : index
    %c0_63 = arith.constant 0 : index
    %101 = vector.load %arg12[%c56, %c0_63] : memref<216x512xf32, #tpu.memory_space<vmem>>, vector<8x256xf32>
    tpu.vector_store %arg12[%c56, %c0_63], %100 {strides = array<i32>} : memref<216x512xf32, #tpu.memory_space<vmem>>, vector<8x256xf32>,
    %c0_64 = arith.constant 0 : index
    %c656 = arith.constant 656 : index
    %102 = vector.load %arg11[%c0_64, %c656] : memref<32x1024xf32, #tpu.memory_space<vmem>>, vector<8x256xf32>
    %c56_65 = arith.constant 56 : index
    %c256_66 = arith.constant 256 : index
    %103 = vector.load %arg12[%c56_65, %c256_66] : memref<216x512xf32, #tpu.memory_space<vmem>>, vector<8x256xf32>
    tpu.vector_store %arg12[%c56_65, %c256_66], %102 {strides = array<i32>} : memref<216x512xf32, #tpu.memory_space<vmem>>, vector<8x256xf32>,
    %c0_67 = arith.constant 0 : index
    %c145 = arith.constant 145 : index
    %104 = vector.load %arg11[%c0_67, %c145] : memref<32x1024xf32, #tpu.memory_space<vmem>>, vector<8x256xf32>
    %cst_68 = arith.constant 0.000000e+00 : f32
    %105 = vector.broadcast %cst_68 : f32 to vector<8x256xf32>
    %106 = vector.shape_cast %31 : vector<1x256xi1> to vector<1x256xi1>
    %107 = vector.broadcast %106 : vector<1x256xi1> to vector<8x256xi1>
    %108 = arith.select %107, %104, %105 : vector<8x256xi1>, vector<8x256xf32>
    %c64 = arith.constant 64 : index
    %c0_69 = arith.constant 0 : index
    %109 = vector.load %arg12[%c64, %c0_69] : memref<216x512xf32, #tpu.memory_space<vmem>>, vector<8x256xf32>
    tpu.vector_store %arg12[%c64, %c0_69], %108 {strides = array<i32>} : memref<216x512xf32, #tpu.memory_space<vmem>>, vector<8x256xf32>,
    %c0_70 = arith.constant 0 : index
    %c657 = arith.constant 657 : index
    %110 = vector.load %arg11[%c0_70, %c657] : memref<32x1024xf32, #tpu.memory_space<vmem>>, vector<8x256xf32>
    %cst_71 = arith.constant 0.000000e+00 : f32
    %111 = vector.broadcast %cst_71 : f32 to vector<8x256xf32>
    %112 = vector.shape_cast %31 : vector<1x256xi1> to vector<1x256xi1>
    %113 = vector.broadcast %112 : vector<1x256xi1> to vector<8x256xi1>
    %114 = arith.select %113, %110, %111 : vector<8x256xi1>, vector<8x256xf32>
    %c64_72 = arith.constant 64 : index
    %c256_73 = arith.constant 256 : index
    %115 = vector.load %arg12[%c64_72, %c256_73] : memref<216x512xf32, #tpu.memory_space<vmem>>, vector<8x256xf32>
    tpu.vector_store %arg12[%c64_72, %c256_73], %114 {strides = array<i32>} : memref<216x512xf32, #tpu.memory_space<vmem>>, vector<8x256xf32>,
    %c0_74 = arith.constant 0 : index
    %c0_75 = arith.constant 0 : index
    %116 = vector.load %arg2[%c0_74, %c0_75] : memref<8x72xf32, #tpu.memory_space<vmem>>, vector<8x72xf32>
    %c0_76 = arith.constant 0 : index
    %c0_77 = arith.constant 0 : index
    %117 = vector.load %arg12[%c0_76, %c0_77] : memref<216x512xf32, #tpu.memory_space<vmem>>, vector<72x512xf32>
    %cst_78 = arith.constant dense<0.000000e+00> : vector<8x512xf32>
    %118 = tpu.matmul %116, %117, %cst_78 {dimension_numbers = #tpu.dot_dimension_numbers<[1], [0], [0], [1], [0, 0, 1, 1], [], []>} : vector<8x72xf32>, vector<72x512xf32>, vector<8x512xf32> -> vector<8x512xf32>
    %c0_79 = arith.constant 0 : index
    %c0_80 = arith.constant 0 : index
    %119 = vector.load %arg3[%c0_79, %c0_80] : memref<8x1xf32, #tpu.memory_space<vmem>>, vector<8x1xf32>
    %120 = vector.broadcast %119 : vector<8x1xf32> to vector<8x512xf32>
    %121 = arith.addf %118, %120 : vector<8x512xf32>
    %cst_81 = arith.constant 0.000000e+00 : f32
    %122 = vector.broadcast %cst_81 : f32 to vector<8x512xf32>
    %123 = arith.maximumf %121, %122 : vector<8x512xf32>
    %124 = vector.extract_strided_slice %123 {offsets = [0, 0], sizes = [8, 256], strides = [1, 1]} : vector<8x512xf32> to vector<8x256xf32>
    %c8_82 = arith.constant 8 : index
    %c128_83 = arith.constant 128 : index
    %125 = vector.load %arg11[%c8_82, %c128_83] : memref<32x1024xf32, #tpu.memory_space<vmem>>, vector<8x256xf32>
    tpu.vector_store %arg11[%c8_82, %c128_83], %124 {strides = array<i32>} : memref<32x1024xf32, #tpu.memory_space<vmem>>, vector<8x256xf32>,
    %126 = vector.extract_strided_slice %123 {offsets = [0, 256], sizes = [8, 256], strides = [1, 1]} : vector<8x512xf32> to vector<8x256xf32>
    %c8_84 = arith.constant 8 : index
    %c640_85 = arith.constant 640 : index
    %127 = vector.load %arg11[%c8_84, %c640_85] : memref<32x1024xf32, #tpu.memory_space<vmem>>, vector<8x256xf32>
    tpu.vector_store %arg11[%c8_84, %c640_85], %126 {strides = array<i32>} : memref<32x1024xf32, #tpu.memory_space<vmem>>, vector<8x256xf32>,
    %c8_86 = arith.constant 8 : index
    %c111_87 = arith.constant 111 : index
    %128 = vector.load %arg11[%c8_86, %c111_87] : memref<32x1024xf32, #tpu.memory_space<vmem>>, vector<8x256xf32>
    %cst_88 = arith.constant 0.000000e+00 : f32
    %129 = vector.broadcast %cst_88 : f32 to vector<8x256xf32>
    %130 = vector.shape_cast %29 : vector<1x256xi1> to vector<1x256xi1>
    %131 = vector.broadcast %130 : vector<1x256xi1> to vector<8x256xi1>
    %132 = arith.select %131, %128, %129 : vector<8x256xi1>, vector<8x256xf32>
    %c72 = arith.constant 72 : index
    %c0_89 = arith.constant 0 : index
    %133 = vector.load %arg12[%c72, %c0_89] : memref<216x512xf32, #tpu.memory_space<vmem>>, vector<8x256xf32>
    tpu.vector_store %arg12[%c72, %c0_89], %132 {strides = array<i32>} : memref<216x512xf32, #tpu.memory_space<vmem>>, vector<8x256xf32>,
    %c8_90 = arith.constant 8 : index
    %c623_91 = arith.constant 623 : index
    %134 = vector.load %arg11[%c8_90, %c623_91] : memref<32x1024xf32, #tpu.memory_space<vmem>>, vector<8x256xf32>
    %cst_92 = arith.constant 0.000000e+00 : f32
    %135 = vector.broadcast %cst_92 : f32 to vector<8x256xf32>
    %136 = vector.shape_cast %29 : vector<1x256xi1> to vector<1x256xi1>
    %137 = vector.broadcast %136 : vector<1x256xi1> to vector<8x256xi1>
    %138 = arith.select %137, %134, %135 : vector<8x256xi1>, vector<8x256xf32>
    %c72_93 = arith.constant 72 : index
    %c256_94 = arith.constant 256 : index
    %139 = vector.load %arg12[%c72_93, %c256_94] : memref<216x512xf32, #tpu.memory_space<vmem>>, vector<8x256xf32>
    tpu.vector_store %arg12[%c72_93, %c256_94], %138 {strides = array<i32>} : memref<216x512xf32, #tpu.memory_space<vmem>>, vector<8x256xf32>,
    %c8_95 = arith.constant 8 : index
    %c112_96 = arith.constant 112 : index
    %140 = vector.load %arg11[%c8_95, %c112_96] : memref<32x1024xf32, #tpu.memory_space<vmem>>, vector<8x256xf32>
    %c80 = arith.constant 80 : index
    %c0_97 = arith.constant 0 : index
    %141 = vector.load %arg12[%c80, %c0_97] : memref<216x512xf32, #tpu.memory_space<vmem>>, vector<8x256xf32>
    tpu.vector_store %arg12[%c80, %c0_97], %140 {strides = array<i32>} : memref<216x512xf32, #tpu.memory_space<vmem>>, vector<8x256xf32>,
    %c8_98 = arith.constant 8 : index
    %c624_99 = arith.constant 624 : index
    %142 = vector.load %arg11[%c8_98, %c624_99] : memref<32x1024xf32, #tpu.memory_space<vmem>>, vector<8x256xf32>
    %c80_100 = arith.constant 80 : index
    %c256_101 = arith.constant 256 : index
    %143 = vector.load %arg12[%c80_100, %c256_101] : memref<216x512xf32, #tpu.memory_space<vmem>>, vector<8x256xf32>
    tpu.vector_store %arg12[%c80_100, %c256_101], %142 {strides = array<i32>} : memref<216x512xf32, #tpu.memory_space<vmem>>, vector<8x256xf32>,
    %c8_102 = arith.constant 8 : index
    %c113_103 = arith.constant 113 : index
    %144 = vector.load %arg11[%c8_102, %c113_103] : memref<32x1024xf32, #tpu.memory_space<vmem>>, vector<8x256xf32>
    %cst_104 = arith.constant 0.000000e+00 : f32
    %145 = vector.broadcast %cst_104 : f32 to vector<8x256xf32>
    %146 = vector.shape_cast %31 : vector<1x256xi1> to vector<1x256xi1>
    %147 = vector.broadcast %146 : vector<1x256xi1> to vector<8x256xi1>
    %148 = arith.select %147, %144, %145 : vector<8x256xi1>, vector<8x256xf32>
    %c88 = arith.constant 88 : index
    %c0_105 = arith.constant 0 : index
    %149 = vector.load %arg12[%c88, %c0_105] : memref<216x512xf32, #tpu.memory_space<vmem>>, vector<8x256xf32>
    tpu.vector_store %arg12[%c88, %c0_105], %148 {strides = array<i32>} : memref<216x512xf32, #tpu.memory_space<vmem>>, vector<8x256xf32>,
    %c8_106 = arith.constant 8 : index
    %c625_107 = arith.constant 625 : index
    %150 = vector.load %arg11[%c8_106, %c625_107] : memref<32x1024xf32, #tpu.memory_space<vmem>>, vector<8x256xf32>
    %cst_108 = arith.constant 0.000000e+00 : f32
    %151 = vector.broadcast %cst_108 : f32 to vector<8x256xf32>
    %152 = vector.shape_cast %31 : vector<1x256xi1> to vector<1x256xi1>
    %153 = vector.broadcast %152 : vector<1x256xi1> to vector<8x256xi1>
    %154 = arith.select %153, %150, %151 : vector<8x256xi1>, vector<8x256xf32>
    %c88_109 = arith.constant 88 : index
    %c256_110 = arith.constant 256 : index
    %155 = vector.load %arg12[%c88_109, %c256_110] : memref<216x512xf32, #tpu.memory_space<vmem>>, vector<8x256xf32>
    tpu.vector_store %arg12[%c88_109, %c256_110], %154 {strides = array<i32>} : memref<216x512xf32, #tpu.memory_space<vmem>>, vector<8x256xf32>,
    %c8_111 = arith.constant 8 : index
    %c127_112 = arith.constant 127 : index
    %156 = vector.load %arg11[%c8_111, %c127_112] : memref<32x1024xf32, #tpu.memory_space<vmem>>, vector<8x256xf32>
    %cst_113 = arith.constant 0.000000e+00 : f32
    %157 = vector.broadcast %cst_113 : f32 to vector<8x256xf32>
    %158 = vector.shape_cast %29 : vector<1x256xi1> to vector<1x256xi1>
    %159 = vector.broadcast %158 : vector<1x256xi1> to vector<8x256xi1>
    %160 = arith.select %159, %156, %157 : vector<8x256xi1>, vector<8x256xf32>
    %c96 = arith.constant 96 : index
    %c0_114 = arith.constant 0 : index
    %161 = vector.load %arg12[%c96, %c0_114] : memref<216x512xf32, #tpu.memory_space<vmem>>, vector<8x256xf32>
    tpu.vector_store %arg12[%c96, %c0_114], %160 {strides = array<i32>} : memref<216x512xf32, #tpu.memory_space<vmem>>, vector<8x256xf32>,
    %c8_115 = arith.constant 8 : index
    %c639_116 = arith.constant 639 : index
    %162 = vector.load %arg11[%c8_115, %c639_116] : memref<32x1024xf32, #tpu.memory_space<vmem>>, vector<8x256xf32>
    %cst_117 = arith.constant 0.000000e+00 : f32
    %163 = vector.broadcast %cst_117 : f32 to vector<8x256xf32>
    %164 = vector.shape_cast %29 : vector<1x256xi1> to vector<1x256xi1>
    %165 = vector.broadcast %164 : vector<1x256xi1> to vector<8x256xi1>
    %166 = arith.select %165, %162, %163 : vector<8x256xi1>, vector<8x256xf32>
    %c96_118 = arith.constant 96 : index
    %c256_119 = arith.constant 256 : index
    %167 = vector.load %arg12[%c96_118, %c256_119] : memref<216x512xf32, #tpu.memory_space<vmem>>, vector<8x256xf32>
    tpu.vector_store %arg12[%c96_118, %c256_119], %166 {strides = array<i32>} : memref<216x512xf32, #tpu.memory_space<vmem>>, vector<8x256xf32>,
    %c8_120 = arith.constant 8 : index
    %c128_121 = arith.constant 128 : index
    %168 = vector.load %arg11[%c8_120, %c128_121] : memref<32x1024xf32, #tpu.memory_space<vmem>>, vector<8x256xf32>
    %c104 = arith.constant 104 : index
    %c0_122 = arith.constant 0 : index
    %169 = vector.load %arg12[%c104, %c0_122] : memref<216x512xf32, #tpu.memory_space<vmem>>, vector<8x256xf32>
    tpu.vector_store %arg12[%c104, %c0_122], %168 {strides = array<i32>} : memref<216x512xf32, #tpu.memory_space<vmem>>, vector<8x256xf32>,
    %c8_123 = arith.constant 8 : index
    %c640_124 = arith.constant 640 : index
    %170 = vector.load %arg11[%c8_123, %c640_124] : memref<32x1024xf32, #tpu.memory_space<vmem>>, vector<8x256xf32>
    %c104_125 = arith.constant 104 : index
    %c256_126 = arith.constant 256 : index
    %171 = vector.load %arg12[%c104_125, %c256_126] : memref<216x512xf32, #tpu.memory_space<vmem>>, vector<8x256xf32>
    tpu.vector_store %arg12[%c104_125, %c256_126], %170 {strides = array<i32>} : memref<216x512xf32, #tpu.memory_space<vmem>>, vector<8x256xf32>,
    %c8_127 = arith.constant 8 : index
    %c129_128 = arith.constant 129 : index
    %172 = vector.load %arg11[%c8_127, %c129_128] : memref<32x1024xf32, #tpu.memory_space<vmem>>, vector<8x256xf32>
    %cst_129 = arith.constant 0.000000e+00 : f32
    %173 = vector.broadcast %cst_129 : f32 to vector<8x256xf32>
    %174 = vector.shape_cast %31 : vector<1x256xi1> to vector<1x256xi1>
    %175 = vector.broadcast %174 : vector<1x256xi1> to vector<8x256xi1>
    %176 = arith.select %175, %172, %173 : vector<8x256xi1>, vector<8x256xf32>
    %c112_130 = arith.constant 112 : index
    %c0_131 = arith.constant 0 : index
    %177 = vector.load %arg12[%c112_130, %c0_131] : memref<216x512xf32, #tpu.memory_space<vmem>>, vector<8x256xf32>
    tpu.vector_store %arg12[%c112_130, %c0_131], %176 {strides = array<i32>} : memref<216x512xf32, #tpu.memory_space<vmem>>, vector<8x256xf32>,
    %c8_132 = arith.constant 8 : index
    %c641_133 = arith.constant 641 : index
    %178 = vector.load %arg11[%c8_132, %c641_133] : memref<32x1024xf32, #tpu.memory_space<vmem>>, vector<8x256xf32>
    %cst_134 = arith.constant 0.000000e+00 : f32
    %179 = vector.broadcast %cst_134 : f32 to vector<8x256xf32>
    %180 = vector.shape_cast %31 : vector<1x256xi1> to vector<1x256xi1>
    %181 = vector.broadcast %180 : vector<1x256xi1> to vector<8x256xi1>
    %182 = arith.select %181, %178, %179 : vector<8x256xi1>, vector<8x256xf32>
    %c112_135 = arith.constant 112 : index
    %c256_136 = arith.constant 256 : index
    %183 = vector.load %arg12[%c112_135, %c256_136] : memref<216x512xf32, #tpu.memory_space<vmem>>, vector<8x256xf32>
    tpu.vector_store %arg12[%c112_135, %c256_136], %182 {strides = array<i32>} : memref<216x512xf32, #tpu.memory_space<vmem>>, vector<8x256xf32>,
    %c8_137 = arith.constant 8 : index
    %c143_138 = arith.constant 143 : index
    %184 = vector.load %arg11[%c8_137, %c143_138] : memref<32x1024xf32, #tpu.memory_space<vmem>>, vector<8x256xf32>
    %cst_139 = arith.constant 0.000000e+00 : f32
    %185 = vector.broadcast %cst_139 : f32 to vector<8x256xf32>
    %186 = vector.shape_cast %29 : vector<1x256xi1> to vector<1x256xi1>
    %187 = vector.broadcast %186 : vector<1x256xi1> to vector<8x256xi1>
    %188 = arith.select %187, %184, %185 : vector<8x256xi1>, vector<8x256xf32>
    %c120 = arith.constant 120 : index
    %c0_140 = arith.constant 0 : index
    %189 = vector.load %arg12[%c120, %c0_140] : memref<216x512xf32, #tpu.memory_space<vmem>>, vector<8x256xf32>
    tpu.vector_store %arg12[%c120, %c0_140], %188 {strides = array<i32>} : memref<216x512xf32, #tpu.memory_space<vmem>>, vector<8x256xf32>,
    %c8_141 = arith.constant 8 : index
    %c655_142 = arith.constant 655 : index
    %190 = vector.load %arg11[%c8_141, %c655_142] : memref<32x1024xf32, #tpu.memory_space<vmem>>, vector<8x256xf32>
    %cst_143 = arith.constant 0.000000e+00 : f32
    %191 = vector.broadcast %cst_143 : f32 to vector<8x256xf32>
    %192 = vector.shape_cast %29 : vector<1x256xi1> to vector<1x256xi1>
    %193 = vector.broadcast %192 : vector<1x256xi1> to vector<8x256xi1>
    %194 = arith.select %193, %190, %191 : vector<8x256xi1>, vector<8x256xf32>
    %c120_144 = arith.constant 120 : index
    %c256_145 = arith.constant 256 : index
    %195 = vector.load %arg12[%c120_144, %c256_145] : memref<216x512xf32, #tpu.memory_space<vmem>>, vector<8x256xf32>
    tpu.vector_store %arg12[%c120_144, %c256_145], %194 {strides = array<i32>} : memref<216x512xf32, #tpu.memory_space<vmem>>, vector<8x256xf32>,
    %c8_146 = arith.constant 8 : index
    %c144_147 = arith.constant 144 : index
    %196 = vector.load %arg11[%c8_146, %c144_147] : memref<32x1024xf32, #tpu.memory_space<vmem>>, vector<8x256xf32>
    %c128_148 = arith.constant 128 : index
    %c0_149 = arith.constant 0 : index
    %197 = vector.load %arg12[%c128_148, %c0_149] : memref<216x512xf32, #tpu.memory_space<vmem>>, vector<8x256xf32>
    tpu.vector_store %arg12[%c128_148, %c0_149], %196 {strides = array<i32>} : memref<216x512xf32, #tpu.memory_space<vmem>>, vector<8x256xf32>,
    %c8_150 = arith.constant 8 : index
    %c656_151 = arith.constant 656 : index
    %198 = vector.load %arg11[%c8_150, %c656_151] : memref<32x1024xf32, #tpu.memory_space<vmem>>, vector<8x256xf32>
    %c128_152 = arith.constant 128 : index
    %c256_153 = arith.constant 256 : index
    %199 = vector.load %arg12[%c128_152, %c256_153] : memref<216x512xf32, #tpu.memory_space<vmem>>, vector<8x256xf32>
    tpu.vector_store %arg12[%c128_152, %c256_153], %198 {strides = array<i32>} : memref<216x512xf32, #tpu.memory_space<vmem>>, vector<8x256xf32>,
    %c8_154 = arith.constant 8 : index
    %c145_155 = arith.constant 145 : index
    %200 = vector.load %arg11[%c8_154, %c145_155] : memref<32x1024xf32, #tpu.memory_space<vmem>>, vector<8x256xf32>
    %cst_156 = arith.constant 0.000000e+00 : f32
    %201 = vector.broadcast %cst_156 : f32 to vector<8x256xf32>
    %202 = vector.shape_cast %31 : vector<1x256xi1> to vector<1x256xi1>
    %203 = vector.broadcast %202 : vector<1x256xi1> to vector<8x256xi1>
    %204 = arith.select %203, %200, %201 : vector<8x256xi1>, vector<8x256xf32>
    %c136 = arith.constant 136 : index
    %c0_157 = arith.constant 0 : index
    %205 = vector.load %arg12[%c136, %c0_157] : memref<216x512xf32, #tpu.memory_space<vmem>>, vector<8x256xf32>
    tpu.vector_store %arg12[%c136, %c0_157], %204 {strides = array<i32>} : memref<216x512xf32, #tpu.memory_space<vmem>>, vector<8x256xf32>,
    %c8_158 = arith.constant 8 : index
    %c657_159 = arith.constant 657 : index
    %206 = vector.load %arg11[%c8_158, %c657_159] : memref<32x1024xf32, #tpu.memory_space<vmem>>, vector<8x256xf32>
    %cst_160 = arith.constant 0.000000e+00 : f32
    %207 = vector.broadcast %cst_160 : f32 to vector<8x256xf32>
    %208 = vector.shape_cast %31 : vector<1x256xi1> to vector<1x256xi1>
    %209 = vector.broadcast %208 : vector<1x256xi1> to vector<8x256xi1>
    %210 = arith.select %209, %206, %207 : vector<8x256xi1>, vector<8x256xf32>
    %c136_161 = arith.constant 136 : index
    %c256_162 = arith.constant 256 : index
    %211 = vector.load %arg12[%c136_161, %c256_162] : memref<216x512xf32, #tpu.memory_space<vmem>>, vector<8x256xf32>
    tpu.vector_store %arg12[%c136_161, %c256_162], %210 {strides = array<i32>} : memref<216x512xf32, #tpu.memory_space<vmem>>, vector<8x256xf32>,
    %c0_163 = arith.constant 0 : index
    %c0_164 = arith.constant 0 : index
    %212 = vector.load %arg4[%c0_163, %c0_164] : memref<8x144xf32, #tpu.memory_space<vmem>>, vector<8x144xf32>
    %c0_165 = arith.constant 0 : index
    %c0_166 = arith.constant 0 : index
    %213 = vector.load %arg12[%c0_165, %c0_166] : memref<216x512xf32, #tpu.memory_space<vmem>>, vector<144x512xf32>
    %cst_167 = arith.constant dense<0.000000e+00> : vector<8x512xf32>
    %214 = tpu.matmul %212, %213, %cst_167 {dimension_numbers = #tpu.dot_dimension_numbers<[1], [0], [0], [1], [0, 0, 1, 1], [], []>} : vector<8x144xf32>, vector<144x512xf32>, vector<8x512xf32> -> vector<8x512xf32>
    %c0_168 = arith.constant 0 : index
    %c0_169 = arith.constant 0 : index
    %215 = vector.load %arg5[%c0_168, %c0_169] : memref<8x1xf32, #tpu.memory_space<vmem>>, vector<8x1xf32>
    %216 = vector.broadcast %215 : vector<8x1xf32> to vector<8x512xf32>
    %217 = arith.addf %214, %216 : vector<8x512xf32>
    %cst_170 = arith.constant 0.000000e+00 : f32
    %218 = vector.broadcast %cst_170 : f32 to vector<8x512xf32>
    %219 = arith.maximumf %217, %218 : vector<8x512xf32>
    %220 = vector.extract_strided_slice %219 {offsets = [0, 0], sizes = [8, 256], strides = [1, 1]} : vector<8x512xf32> to vector<8x256xf32>
    %c16_171 = arith.constant 16 : index
    %c128_172 = arith.constant 128 : index
    %221 = vector.load %arg11[%c16_171, %c128_172] : memref<32x1024xf32, #tpu.memory_space<vmem>>, vector<8x256xf32>
    tpu.vector_store %arg11[%c16_171, %c128_172], %220 {strides = array<i32>} : memref<32x1024xf32, #tpu.memory_space<vmem>>, vector<8x256xf32>,
    %222 = vector.extract_strided_slice %219 {offsets = [0, 256], sizes = [8, 256], strides = [1, 1]} : vector<8x512xf32> to vector<8x256xf32>
    %c16_173 = arith.constant 16 : index
    %c640_174 = arith.constant 640 : index
    %223 = vector.load %arg11[%c16_173, %c640_174] : memref<32x1024xf32, #tpu.memory_space<vmem>>, vector<8x256xf32>
    tpu.vector_store %arg11[%c16_173, %c640_174], %222 {strides = array<i32>} : memref<32x1024xf32, #tpu.memory_space<vmem>>, vector<8x256xf32>,
    %c16_175 = arith.constant 16 : index
    %c111_176 = arith.constant 111 : index
    %224 = vector.load %arg11[%c16_175, %c111_176] : memref<32x1024xf32, #tpu.memory_space<vmem>>, vector<8x256xf32>
    %cst_177 = arith.constant 0.000000e+00 : f32
    %225 = vector.broadcast %cst_177 : f32 to vector<8x256xf32>
    %226 = vector.shape_cast %29 : vector<1x256xi1> to vector<1x256xi1>
    %227 = vector.broadcast %226 : vector<1x256xi1> to vector<8x256xi1>
    %228 = arith.select %227, %224, %225 : vector<8x256xi1>, vector<8x256xf32>
    %c144_178 = arith.constant 144 : index
    %c0_179 = arith.constant 0 : index
    %229 = vector.load %arg12[%c144_178, %c0_179] : memref<216x512xf32, #tpu.memory_space<vmem>>, vector<8x256xf32>
    tpu.vector_store %arg12[%c144_178, %c0_179], %228 {strides = array<i32>} : memref<216x512xf32, #tpu.memory_space<vmem>>, vector<8x256xf32>,
    %c16_180 = arith.constant 16 : index
    %c623_181 = arith.constant 623 : index
    %230 = vector.load %arg11[%c16_180, %c623_181] : memref<32x1024xf32, #tpu.memory_space<vmem>>, vector<8x256xf32>
    %cst_182 = arith.constant 0.000000e+00 : f32
    %231 = vector.broadcast %cst_182 : f32 to vector<8x256xf32>
    %232 = vector.shape_cast %29 : vector<1x256xi1> to vector<1x256xi1>
    %233 = vector.broadcast %232 : vector<1x256xi1> to vector<8x256xi1>
    %234 = arith.select %233, %230, %231 : vector<8x256xi1>, vector<8x256xf32>
    %c144_183 = arith.constant 144 : index
    %c256_184 = arith.constant 256 : index
    %235 = vector.load %arg12[%c144_183, %c256_184] : memref<216x512xf32, #tpu.memory_space<vmem>>, vector<8x256xf32>
    tpu.vector_store %arg12[%c144_183, %c256_184], %234 {strides = array<i32>} : memref<216x512xf32, #tpu.memory_space<vmem>>, vector<8x256xf32>,
    %c16_185 = arith.constant 16 : index
    %c112_186 = arith.constant 112 : index
    %236 = vector.load %arg11[%c16_185, %c112_186] : memref<32x1024xf32, #tpu.memory_space<vmem>>, vector<8x256xf32>
    %c152 = arith.constant 152 : index
    %c0_187 = arith.constant 0 : index
    %237 = vector.load %arg12[%c152, %c0_187] : memref<216x512xf32, #tpu.memory_space<vmem>>, vector<8x256xf32>
    tpu.vector_store %arg12[%c152, %c0_187], %236 {strides = array<i32>} : memref<216x512xf32, #tpu.memory_space<vmem>>, vector<8x256xf32>,
    %c16_188 = arith.constant 16 : index
    %c624_189 = arith.constant 624 : index
    %238 = vector.load %arg11[%c16_188, %c624_189] : memref<32x1024xf32, #tpu.memory_space<vmem>>, vector<8x256xf32>
    %c152_190 = arith.constant 152 : index
    %c256_191 = arith.constant 256 : index
    %239 = vector.load %arg12[%c152_190, %c256_191] : memref<216x512xf32, #tpu.memory_space<vmem>>, vector<8x256xf32>
    tpu.vector_store %arg12[%c152_190, %c256_191], %238 {strides = array<i32>} : memref<216x512xf32, #tpu.memory_space<vmem>>, vector<8x256xf32>,
    %c16_192 = arith.constant 16 : index
    %c113_193 = arith.constant 113 : index
    %240 = vector.load %arg11[%c16_192, %c113_193] : memref<32x1024xf32, #tpu.memory_space<vmem>>, vector<8x256xf32>
    %cst_194 = arith.constant 0.000000e+00 : f32
    %241 = vector.broadcast %cst_194 : f32 to vector<8x256xf32>
    %242 = vector.shape_cast %31 : vector<1x256xi1> to vector<1x256xi1>
    %243 = vector.broadcast %242 : vector<1x256xi1> to vector<8x256xi1>
    %244 = arith.select %243, %240, %241 : vector<8x256xi1>, vector<8x256xf32>
    %c160 = arith.constant 160 : index
    %c0_195 = arith.constant 0 : index
    %245 = vector.load %arg12[%c160, %c0_195] : memref<216x512xf32, #tpu.memory_space<vmem>>, vector<8x256xf32>
    tpu.vector_store %arg12[%c160, %c0_195], %244 {strides = array<i32>} : memref<216x512xf32, #tpu.memory_space<vmem>>, vector<8x256xf32>,
    %c16_196 = arith.constant 16 : index
    %c625_197 = arith.constant 625 : index
    %246 = vector.load %arg11[%c16_196, %c625_197] : memref<32x1024xf32, #tpu.memory_space<vmem>>, vector<8x256xf32>
    %cst_198 = arith.constant 0.000000e+00 : f32
    %247 = vector.broadcast %cst_198 : f32 to vector<8x256xf32>
    %248 = vector.shape_cast %31 : vector<1x256xi1> to vector<1x256xi1>
    %249 = vector.broadcast %248 : vector<1x256xi1> to vector<8x256xi1>
    %250 = arith.select %249, %246, %247 : vector<8x256xi1>, vector<8x256xf32>
    %c160_199 = arith.constant 160 : index
    %c256_200 = arith.constant 256 : index
    %251 = vector.load %arg12[%c160_199, %c256_200] : memref<216x512xf32, #tpu.memory_space<vmem>>, vector<8x256xf32>
    tpu.vector_store %arg12[%c160_199, %c256_200], %250 {strides = array<i32>} : memref<216x512xf32, #tpu.memory_space<vmem>>, vector<8x256xf32>,
    %c16_201 = arith.constant 16 : index
    %c127_202 = arith.constant 127 : index
    %252 = vector.load %arg11[%c16_201, %c127_202] : memref<32x1024xf32, #tpu.memory_space<vmem>>, vector<8x256xf32>
    %cst_203 = arith.constant 0.000000e+00 : f32
    %253 = vector.broadcast %cst_203 : f32 to vector<8x256xf32>
    %254 = vector.shape_cast %29 : vector<1x256xi1> to vector<1x256xi1>
    %255 = vector.broadcast %254 : vector<1x256xi1> to vector<8x256xi1>
    %256 = arith.select %255, %252, %253 : vector<8x256xi1>, vector<8x256xf32>
    %c168 = arith.constant 168 : index
    %c0_204 = arith.constant 0 : index
    %257 = vector.load %arg12[%c168, %c0_204] : memref<216x512xf32, #tpu.memory_space<vmem>>, vector<8x256xf32>
    tpu.vector_store %arg12[%c168, %c0_204], %256 {strides = array<i32>} : memref<216x512xf32, #tpu.memory_space<vmem>>, vector<8x256xf32>,
    %c16_205 = arith.constant 16 : index
    %c639_206 = arith.constant 639 : index
    %258 = vector.load %arg11[%c16_205, %c639_206] : memref<32x1024xf32, #tpu.memory_space<vmem>>, vector<8x256xf32>
    %cst_207 = arith.constant 0.000000e+00 : f32
    %259 = vector.broadcast %cst_207 : f32 to vector<8x256xf32>
    %260 = vector.shape_cast %29 : vector<1x256xi1> to vector<1x256xi1>
    %261 = vector.broadcast %260 : vector<1x256xi1> to vector<8x256xi1>
    %262 = arith.select %261, %258, %259 : vector<8x256xi1>, vector<8x256xf32>
    %c168_208 = arith.constant 168 : index
    %c256_209 = arith.constant 256 : index
    %263 = vector.load %arg12[%c168_208, %c256_209] : memref<216x512xf32, #tpu.memory_space<vmem>>, vector<8x256xf32>
    tpu.vector_store %arg12[%c168_208, %c256_209], %262 {strides = array<i32>} : memref<216x512xf32, #tpu.memory_space<vmem>>, vector<8x256xf32>,
    %c16_210 = arith.constant 16 : index
    %c128_211 = arith.constant 128 : index
    %264 = vector.load %arg11[%c16_210, %c128_211] : memref<32x1024xf32, #tpu.memory_space<vmem>>, vector<8x256xf32>
    %c176 = arith.constant 176 : index
    %c0_212 = arith.constant 0 : index
    %265 = vector.load %arg12[%c176, %c0_212] : memref<216x512xf32, #tpu.memory_space<vmem>>, vector<8x256xf32>
    tpu.vector_store %arg12[%c176, %c0_212], %264 {strides = array<i32>} : memref<216x512xf32, #tpu.memory_space<vmem>>, vector<8x256xf32>,
    %c16_213 = arith.constant 16 : index
    %c640_214 = arith.constant 640 : index
    %266 = vector.load %arg11[%c16_213, %c640_214] : memref<32x1024xf32, #tpu.memory_space<vmem>>, vector<8x256xf32>
    %c176_215 = arith.constant 176 : index
    %c256_216 = arith.constant 256 : index
    %267 = vector.load %arg12[%c176_215, %c256_216] : memref<216x512xf32, #tpu.memory_space<vmem>>, vector<8x256xf32>
    tpu.vector_store %arg12[%c176_215, %c256_216], %266 {strides = array<i32>} : memref<216x512xf32, #tpu.memory_space<vmem>>, vector<8x256xf32>,
    %c16_217 = arith.constant 16 : index
    %c129_218 = arith.constant 129 : index
    %268 = vector.load %arg11[%c16_217, %c129_218] : memref<32x1024xf32, #tpu.memory_space<vmem>>, vector<8x256xf32>
    %cst_219 = arith.constant 0.000000e+00 : f32
    %269 = vector.broadcast %cst_219 : f32 to vector<8x256xf32>
    %270 = vector.shape_cast %31 : vector<1x256xi1> to vector<1x256xi1>
    %271 = vector.broadcast %270 : vector<1x256xi1> to vector<8x256xi1>
    %272 = arith.select %271, %268, %269 : vector<8x256xi1>, vector<8x256xf32>
    %c184 = arith.constant 184 : index
    %c0_220 = arith.constant 0 : index
    %273 = vector.load %arg12[%c184, %c0_220] : memref<216x512xf32, #tpu.memory_space<vmem>>, vector<8x256xf32>
    tpu.vector_store %arg12[%c184, %c0_220], %272 {strides = array<i32>} : memref<216x512xf32, #tpu.memory_space<vmem>>, vector<8x256xf32>,
    %c16_221 = arith.constant 16 : index
    %c641_222 = arith.constant 641 : index
    %274 = vector.load %arg11[%c16_221, %c641_222] : memref<32x1024xf32, #tpu.memory_space<vmem>>, vector<8x256xf32>
    %cst_223 = arith.constant 0.000000e+00 : f32
    %275 = vector.broadcast %cst_223 : f32 to vector<8x256xf32>
    %276 = vector.shape_cast %31 : vector<1x256xi1> to vector<1x256xi1>
    %277 = vector.broadcast %276 : vector<1x256xi1> to vector<8x256xi1>
    %278 = arith.select %277, %274, %275 : vector<8x256xi1>, vector<8x256xf32>
    %c184_224 = arith.constant 184 : index
    %c256_225 = arith.constant 256 : index
    %279 = vector.load %arg12[%c184_224, %c256_225] : memref<216x512xf32, #tpu.memory_space<vmem>>, vector<8x256xf32>
    tpu.vector_store %arg12[%c184_224, %c256_225], %278 {strides = array<i32>} : memref<216x512xf32, #tpu.memory_space<vmem>>, vector<8x256xf32>,
    %c16_226 = arith.constant 16 : index
    %c143_227 = arith.constant 143 : index
    %280 = vector.load %arg11[%c16_226, %c143_227] : memref<32x1024xf32, #tpu.memory_space<vmem>>, vector<8x256xf32>
    %cst_228 = arith.constant 0.000000e+00 : f32
    %281 = vector.broadcast %cst_228 : f32 to vector<8x256xf32>
    %282 = vector.shape_cast %29 : vector<1x256xi1> to vector<1x256xi1>
    %283 = vector.broadcast %282 : vector<1x256xi1> to vector<8x256xi1>
    %284 = arith.select %283, %280, %281 : vector<8x256xi1>, vector<8x256xf32>
    %c192 = arith.constant 192 : index
    %c0_229 = arith.constant 0 : index
    %285 = vector.load %arg12[%c192, %c0_229] : memref<216x512xf32, #tpu.memory_space<vmem>>, vector<8x256xf32>
    tpu.vector_store %arg12[%c192, %c0_229], %284 {strides = array<i32>} : memref<216x512xf32, #tpu.memory_space<vmem>>, vector<8x256xf32>,
    %c16_230 = arith.constant 16 : index
    %c655_231 = arith.constant 655 : index
    %286 = vector.load %arg11[%c16_230, %c655_231] : memref<32x1024xf32, #tpu.memory_space<vmem>>, vector<8x256xf32>
    %cst_232 = arith.constant 0.000000e+00 : f32
    %287 = vector.broadcast %cst_232 : f32 to vector<8x256xf32>
    %288 = vector.shape_cast %29 : vector<1x256xi1> to vector<1x256xi1>
    %289 = vector.broadcast %288 : vector<1x256xi1> to vector<8x256xi1>
    %290 = arith.select %289, %286, %287 : vector<8x256xi1>, vector<8x256xf32>
    %c192_233 = arith.constant 192 : index
    %c256_234 = arith.constant 256 : index
    %291 = vector.load %arg12[%c192_233, %c256_234] : memref<216x512xf32, #tpu.memory_space<vmem>>, vector<8x256xf32>
    tpu.vector_store %arg12[%c192_233, %c256_234], %290 {strides = array<i32>} : memref<216x512xf32, #tpu.memory_space<vmem>>, vector<8x256xf32>,
    %c16_235 = arith.constant 16 : index
    %c144_236 = arith.constant 144 : index
    %292 = vector.load %arg11[%c16_235, %c144_236] : memref<32x1024xf32, #tpu.memory_space<vmem>>, vector<8x256xf32>
    %c200 = arith.constant 200 : index
    %c0_237 = arith.constant 0 : index
    %293 = vector.load %arg12[%c200, %c0_237] : memref<216x512xf32, #tpu.memory_space<vmem>>, vector<8x256xf32>
    tpu.vector_store %arg12[%c200, %c0_237], %292 {strides = array<i32>} : memref<216x512xf32, #tpu.memory_space<vmem>>, vector<8x256xf32>,
    %c16_238 = arith.constant 16 : index
    %c656_239 = arith.constant 656 : index
    %294 = vector.load %arg11[%c16_238, %c656_239] : memref<32x1024xf32, #tpu.memory_space<vmem>>, vector<8x256xf32>
    %c200_240 = arith.constant 200 : index
    %c256_241 = arith.constant 256 : index
    %295 = vector.load %arg12[%c200_240, %c256_241] : memref<216x512xf32, #tpu.memory_space<vmem>>, vector<8x256xf32>
    tpu.vector_store %arg12[%c200_240, %c256_241], %294 {strides = array<i32>} : memref<216x512xf32, #tpu.memory_space<vmem>>, vector<8x256xf32>,
    %c16_242 = arith.constant 16 : index
    %c145_243 = arith.constant 145 : index
    %296 = vector.load %arg11[%c16_242, %c145_243] : memref<32x1024xf32, #tpu.memory_space<vmem>>, vector<8x256xf32>
    %cst_244 = arith.constant 0.000000e+00 : f32
    %297 = vector.broadcast %cst_244 : f32 to vector<8x256xf32>
    %298 = vector.shape_cast %31 : vector<1x256xi1> to vector<1x256xi1>
    %299 = vector.broadcast %298 : vector<1x256xi1> to vector<8x256xi1>
    %300 = arith.select %299, %296, %297 : vector<8x256xi1>, vector<8x256xf32>
    %c208 = arith.constant 208 : index
    %c0_245 = arith.constant 0 : index
    %301 = vector.load %arg12[%c208, %c0_245] : memref<216x512xf32, #tpu.memory_space<vmem>>, vector<8x256xf32>
    tpu.vector_store %arg12[%c208, %c0_245], %300 {strides = array<i32>} : memref<216x512xf32, #tpu.memory_space<vmem>>, vector<8x256xf32>,
    %c16_246 = arith.constant 16 : index
    %c657_247 = arith.constant 657 : index
    %302 = vector.load %arg11[%c16_246, %c657_247] : memref<32x1024xf32, #tpu.memory_space<vmem>>, vector<8x256xf32>
    %cst_248 = arith.constant 0.000000e+00 : f32
    %303 = vector.broadcast %cst_248 : f32 to vector<8x256xf32>
    %304 = vector.shape_cast %31 : vector<1x256xi1> to vector<1x256xi1>
    %305 = vector.broadcast %304 : vector<1x256xi1> to vector<8x256xi1>
    %306 = arith.select %305, %302, %303 : vector<8x256xi1>, vector<8x256xf32>
    %c208_249 = arith.constant 208 : index
    %c256_250 = arith.constant 256 : index
    %307 = vector.load %arg12[%c208_249, %c256_250] : memref<216x512xf32, #tpu.memory_space<vmem>>, vector<8x256xf32>
    tpu.vector_store %arg12[%c208_249, %c256_250], %306 {strides = array<i32>} : memref<216x512xf32, #tpu.memory_space<vmem>>, vector<8x256xf32>,
    %c0_251 = arith.constant 0 : index
    %c0_252 = arith.constant 0 : index
    %308 = vector.load %arg6[%c0_251, %c0_252] : memref<8x216xf32, #tpu.memory_space<vmem>>, vector<8x216xf32>
    %c0_253 = arith.constant 0 : index
    %c0_254 = arith.constant 0 : index
    %309 = vector.load %arg12[%c0_253, %c0_254] : memref<216x512xf32, #tpu.memory_space<vmem>>, vector<216x512xf32>
    %cst_255 = arith.constant dense<0.000000e+00> : vector<8x512xf32>
    %310 = tpu.matmul %308, %309, %cst_255 {dimension_numbers = #tpu.dot_dimension_numbers<[1], [0], [0], [1], [0, 0, 1, 1], [], []>} : vector<8x216xf32>, vector<216x512xf32>, vector<8x512xf32> -> vector<8x512xf32>
    %c0_256 = arith.constant 0 : index
    %c0_257 = arith.constant 0 : index
    %311 = vector.load %arg7[%c0_256, %c0_257] : memref<8x1xf32, #tpu.memory_space<vmem>>, vector<8x1xf32>
    %312 = vector.broadcast %311 : vector<8x1xf32> to vector<8x512xf32>
    %313 = arith.addf %310, %312 : vector<8x512xf32>
    %cst_258 = arith.constant 0.000000e+00 : f32
    %314 = vector.broadcast %cst_258 : f32 to vector<8x512xf32>
    %315 = arith.maximumf %313, %314 : vector<8x512xf32>
    %316 = vector.extract_strided_slice %315 {offsets = [0, 0], sizes = [8, 256], strides = [1, 1]} : vector<8x512xf32> to vector<8x256xf32>
    %c24_259 = arith.constant 24 : index
    %c128_260 = arith.constant 128 : index
    %317 = vector.load %arg11[%c24_259, %c128_260] : memref<32x1024xf32, #tpu.memory_space<vmem>>, vector<8x256xf32>
    tpu.vector_store %arg11[%c24_259, %c128_260], %316 {strides = array<i32>} : memref<32x1024xf32, #tpu.memory_space<vmem>>, vector<8x256xf32>,
    %318 = vector.extract_strided_slice %315 {offsets = [0, 256], sizes = [8, 256], strides = [1, 1]} : vector<8x512xf32> to vector<8x256xf32>
    %c24_261 = arith.constant 24 : index
    %c640_262 = arith.constant 640 : index
    %319 = vector.load %arg11[%c24_261, %c640_262] : memref<32x1024xf32, #tpu.memory_space<vmem>>, vector<8x256xf32>
    tpu.vector_store %arg11[%c24_261, %c640_262], %318 {strides = array<i32>} : memref<32x1024xf32, #tpu.memory_space<vmem>>, vector<8x256xf32>,
    %c0_263 = arith.constant 0 : index
    %c0_264 = arith.constant 0 : index
    %320 = vector.load %arg8[%c0_263, %c0_264] : memref<8x32xf32, #tpu.memory_space<vmem>>, vector<8x32xf32>
    %c0_265 = arith.constant 0 : index
    %c128_266 = arith.constant 128 : index
    %321 = vector.load %arg11[%c0_265, %c128_266] : memref<32x1024xf32, #tpu.memory_space<vmem>>, vector<32x256xf32>
    %cst_267 = arith.constant dense<0.000000e+00> : vector<8x256xf32>
    %322 = tpu.matmul %320, %321, %cst_267 {dimension_numbers = #tpu.dot_dimension_numbers<[1], [0], [0], [1], [0, 0, 1, 1], [], []>} : vector<8x32xf32>, vector<32x256xf32>, vector<8x256xf32> -> vector<8x256xf32>
    %c0_268 = arith.constant 0 : index
    %c0_269 = arith.constant 0 : index
    %323 = vector.load %arg9[%c0_268, %c0_269] : memref<8x1xf32, #tpu.memory_space<vmem>>, vector<8x1xf32>
    %324 = vector.broadcast %323 : vector<8x1xf32> to vector<8x256xf32>
    %325 = arith.addf %322, %324 : vector<8x256xf32>
    %c0_270 = arith.constant 0 : index
    %c0_271 = arith.constant 0 : index
    %c0_272 = arith.constant 0 : index
    %326 = vector.load %arg1[%c0_270, %c0_271, %c0_272] : memref<2x8x256xf32, #tpu.memory_space<vmem>>, vector<1x8x256xf32>
    %327 = vector.shape_cast %326 : vector<1x8x256xf32> to vector<8x256xf32>
    %328 = arith.addf %325, %327 : vector<8x256xf32>
    %c0_273 = arith.constant 0 : index
    %c0_274 = arith.constant 0 : index
    %c0_275 = arith.constant 0 : index
    %329 = vector.load %arg10[%c0_273, %c0_274, %c0_275] : memref<2x8x256xf32, #tpu.memory_space<vmem>>, vector<1x8x256xf32>
    %330 = vector.shape_cast %329 : vector<1x8x256xf32> to vector<8x256xf32>
    %331 = vector.shape_cast %328 : vector<8x256xf32> to vector<1x8x256xf32>
    tpu.vector_store %arg10[%c0_273, %c0_274, %c0_275], %331 {strides = array<i32>} : memref<2x8x256xf32, #tpu.memory_space<vmem>>, vector<1x8x256xf32>,
    %c0_276 = arith.constant 0 : index
    %c640_277 = arith.constant 640 : index
    %332 = vector.load %arg11[%c0_276, %c640_277] : memref<32x1024xf32, #tpu.memory_space<vmem>>, vector<32x256xf32>
    %cst_278 = arith.constant dense<0.000000e+00> : vector<8x256xf32>
    %333 = tpu.matmul %320, %332, %cst_278 {dimension_numbers = #tpu.dot_dimension_numbers<[1], [0], [0], [1], [0, 0, 1, 1], [], []>} : vector<8x32xf32>, vector<32x256xf32>, vector<8x256xf32> -> vector<8x256xf32>
    %c0_279 = arith.constant 0 : index
    %c0_280 = arith.constant 0 : index
    %334 = vector.load %arg9[%c0_279, %c0_280] : memref<8x1xf32, #tpu.memory_space<vmem>>, vector<8x1xf32>
    %335 = vector.broadcast %334 : vector<8x1xf32> to vector<8x256xf32>
    %336 = arith.addf %333, %335 : vector<8x256xf32>
    %c1_281 = arith.constant 1 : index
    %c0_282 = arith.constant 0 : index
    %c0_283 = arith.constant 0 : index
    %337 = vector.load %arg1[%c1_281, %c0_282, %c0_283] : memref<2x8x256xf32, #tpu.memory_space<vmem>>, vector<1x8x256xf32>
    %338 = vector.shape_cast %337 : vector<1x8x256xf32> to vector<8x256xf32>
    %339 = arith.addf %336, %338 : vector<8x256xf32>
    %c1_284 = arith.constant 1 : index
    %c0_285 = arith.constant 0 : index
    %c0_286 = arith.constant 0 : index
    %340 = vector.load %arg10[%c1_284, %c0_285, %c0_286] : memref<2x8x256xf32, #tpu.memory_space<vmem>>, vector<1x8x256xf32>
    %341 = vector.shape_cast %340 : vector<1x8x256xf32> to vector<8x256xf32>
    %342 = vector.shape_cast %339 : vector<8x256xf32> to vector<1x8x256xf32>
    tpu.vector_store %arg10[%c1_284, %c0_285, %c0_286], %342 {strides = array<i32>} : memref<2x8x256xf32, #tpu.memory_space<vmem>>, vector<1x8x256xf32>,
    return
  }
  func.func @transform_0(%arg0: i32) -> (i32, i32, i32) {
    %c0_i32 = arith.constant 0 : i32
    %c0_i32_0 = arith.constant 0 : i32
    %c0_i32_1 = arith.constant 0 : i32
    return %arg0, %c0_i32, %c0_i32_0 : i32, i32, i32
  }
  func.func @transform_1(%arg0: i32) -> (i32, i32) {
    %c0_i32 = arith.constant 0 : i32
    %c0_i32_0 = arith.constant 0 : i32
    %c0_i32_1 = arith.constant 0 : i32
    return %c0_i32, %c0_i32_0 : i32, i32
  }
  func.func @transform_2(%arg0: i32) -> (i32, i32) {
    %c0_i32 = arith.constant 0 : i32
    %c0_i32_0 = arith.constant 0 : i32
    %c0_i32_1 = arith.constant 0 : i32
    return %c0_i32, %c0_i32_0 : i32, i32
  }
  func.func @transform_3(%arg0: i32) -> (i32, i32) {
    %c0_i32 = arith.constant 0 : i32
    %c0_i32_0 = arith.constant 0 : i32
    %c0_i32_1 = arith.constant 0 : i32
    return %c0_i32, %c0_i32_0 : i32, i32
  }
  func.func @transform_4(%arg0: i32) -> (i32, i32) {
    %c0_i32 = arith.constant 0 : i32
    %c0_i32_0 = arith.constant 0 : i32
    %c0_i32_1 = arith.constant 0 : i32
    return %c0_i32, %c0_i32_0 : i32, i32
  }
  func.func @transform_5(%arg0: i32) -> (i32, i32) {
    %c0_i32 = arith.constant 0 : i32
    %c0_i32_0 = arith.constant 0 : i32
    %c0_i32_1 = arith.constant 0 : i32
    return %c0_i32, %c0_i32_0 : i32, i32
  }
  func.func @transform_6(%arg0: i32) -> (i32, i32) {
    %c0_i32 = arith.constant 0 : i32
    %c0_i32_0 = arith.constant 0 : i32
    %c0_i32_1 = arith.constant 0 : i32
    return %c0_i32, %c0_i32_0 : i32, i32
  }
  func.func @transform_7(%arg0: i32) -> (i32, i32) {
    %c0_i32 = arith.constant 0 : i32
    %c0_i32_0 = arith.constant 0 : i32
    %c0_i32_1 = arith.constant 0 : i32
    return %c0_i32, %c0_i32_0 : i32, i32
  }
  func.func @transform_8(%arg0: i32) -> (i32, i32) {
    %c0_i32 = arith.constant 0 : i32
    %c0_i32_0 = arith.constant 0 : i32
    %c0_i32_1 = arith.constant 0 : i32
    return %c0_i32, %c0_i32_0 : i32, i32
  }
  func.func @transform_9(%arg0: i32) -> (i32, i32, i32) {
    %c0_i32 = arith.constant 0 : i32
    %c0_i32_0 = arith.constant 0 : i32
    %c0_i32_1 = arith.constant 0 : i32
    return %arg0, %c0_i32, %c0_i32_0 : i32, i32, i32
  }
}

</mosaic_0001>

<bundles_post_ra>
// kernel: rdb_forward.1
= control target key start
LH: loop header
LB: loop body
LE: loop exit
PB: predicated region body
PF: predicated region fallthrough
CT: control target
= control target key end

     0   :  { %s2650_s30 = smov 0   ;;  %s3846_s0 = inlined_call_operand.vmem [shape: f32[4,8,256], index: 0, kind: input, shape index: {}, may-alias: {0,9}]   ;;  %s3847_s1 = inlined_call_operand.vmem [shape: f32[8,72], index: 1, kind: input, shape index: {}]   ;;  %s3848_s2 = inlined_call_operand.vmem [shape: f32[8,1], index: 2, kind: input, shape index: {}]   ;;  %s3849_s3 = inlined_call_operand.vmem [shape: f32[8,144], index: 3, kind: input, shape index: {}]   ;;  %s3850_s4 = inlined_call_operand.vmem [shape: f32[8,1], index: 4, kind: input, shape index: {}]   ;;  %s3851_s5 = inlined_call_operand.vmem [shape: f32[8,216], index: 5, kind: input, shape index: {}]   ;;  %s3852_s6 = inlined_call_operand.vmem [shape: f32[8,1], index: 6, kind: input, shape index: {}]   ;;  %s3853_s7 = inlined_call_operand.vmem [shape: f32[8,32], index: 7, kind: input, shape index: {}]   ;;  %s3854_s8 = inlined_call_operand.vmem [shape: f32[8,1], index: 8, kind: input, shape index: {}]   ;;  %s3855_s9 = inlined_call_operand.vmem [shape: f32[4,8,256], index: 9, kind: output, shape index: {}, may-alias: {0,9}]  }
   0x1 LB: > { %s2231_s10 = sadd.s32 4294967295, %s2588_s30   ;;  %p2235_p0 = scmp.ge.s32.totalorder %s2588_s30, 1  ;;  %s2588_s30 = sphi %s2650_s30, %s19_s30  }
   0x2   : > { %p289_p1 = scmp.lt.s32.totalorder %s2588_s30, 3 }
   0x4   : > { %p290_p2 = pnand %p2235_p0, %p289_p1 }
   0x6   : > { %293 = sbr.rel (%p290_p2) target bundleno = 1147 (0x47b), region = 56 }
   0xb   : > { %s2236_s11 = sshll.u32 %s2231_s10, 1  ;;  %v3856_v0 = vmov 0.0   ;;  %s2591_s12 = smov 111   ;;  %v366_v11 = vlaneseq  ;;  %vm704_vm0 = vcmask 908288   ;;  %vm667_vm2 = vcmask 916480   ;;  %v770_v52 = vld [vmem:[%s3848_s2] sm:$0xff] }
   0xc   : > { %p328_p3 = scmp.lt.s32.totalorder %s2236_s11, 3  ;;  %2431 = vrot.lane.b32.xlu0 %v3856_v0, %s2591_s12  ;;  %s2592_s13 = smov 113   ;;  %vm626_vm3 = vcmask 924672   ;;  %vm585_vm5 = vcmask 1039360   ;;  %vm536_vm8 = vcmask 7168   ;;  %v2599_v53 = vmov 0  }
   0xd   : > { %2436 = vrot.lane.b32.xlu2 %v3856_v0, %s2592_s13  ;;  %s2593_s18 = smov 112   ;;  %s2594_s19 = smov 127   ;;  %v367_v13 = vand.u32 127, %v366_v11  ;;  %2470 = vset.pattern.permute.xlu1 %v2599_v53  ;;  %vm495_vm9 = vcmask 121856   ;;  %vm454_vm10 = vcmask 130048   ;;  %vm413_vm11 = vcmask 138240  }
   0xe   : > { %s3941_s11 = smov (!%p328_p3, %s2236_s11), 3  ;;  %s2595_s20 = smov 1   ;;  %2576 = vset.pattern.permute.xlu0 %v2599_v53  ;;  %2577 = vset.pattern.permute.xlu2 %v2599_v53  ;;  %vm776_vm12 = vcmask 588800   ;;  %vm1875_vm13 = vcmask 719872   ;;  %vm2062_vm14 = vcmask 261120  }
   0xf   : > { %s2266_s14 = sshll.u32 %s3941_s11, 4  ;;  %s2596_s21 = smov 15   ;;  %v368_v14 = vadd.s32 128, %v367_v13  ;;  %v373_v35 = vand.u32 15, %v367_v13  ;;  %v2891_v13 = vld [vmem:[%s3847_s1] sm:$0xff] }
  0x10   : > { %s2670_s17 = scalar_lea.vmem %s3846_s0, %s2266_s14  ;;  %s2597_s22 = smov 16  }
  0x11   : > { %v2673_v1 = vld [vmem:[%s2670_s17 + $0x8] sm:$0xff]  ;;  %v2682_v3 = vld [vmem:[%s2670_s17] sm:$0xff]  ;;  %v2685_v4 = vld [vmem:[%s2670_s17 + $0x18] sm:$0xff]  ;;  %s2598_s23 = smov 17   ;;  %v380_v17 = vand.u32 15, %v368_v14  ;;  %vm2807_vm6 = vcmp.ne.s32.totalorder %v373_v35, 15  ;;  %s339_s29 = scalar_lea.vmem %s3855_s9, %s2266_s14 }
  0x12   : > { %3884 = vst [vmem:[#allocation4_spill] sm:$0xff] %v2673_v1  ;;  %v2445_v2 = vpack.i.bf16 0.0, %v2673_v1  ;;  %v2450_v5 = vpack.i.bf16 %v2685_v4, %v2682_v3  ;;  %v2460_v6 = vpack.i.bf16 %v2673_v1, %v2682_v3  ;;  %v2714_v7 = vld [vmem:[%s2670_s17 + $0x10] sm:$0xff]  ;;  %vm2820_vm7 = vcmp.ne.s32.totalorder %v373_v35, 0 }
  0x13   : > { %v2455_v8 = vpack.i.bf16 %v2714_v7, %v3856_v0  ;;  %vm2768_vm1 = vcmp.ne.s32.totalorder %v380_v17, 15  ;;  %vm2783_vm4 = vcmp.ne.s32.totalorder %v380_v17, 0 }
  0x14   : > { %2446 = vrot.lane.b32.xlu1 %v2445_v2, %s2593_s18  ;;  %700 = vrot.lane.b32.xlu0 %v2673_v1, %s2591_s12 }
  0x15   : > { %581 = vrot.lane.b32.xlu2 %v2673_v1, %s2594_s19 }
  0x1c   : > { %622 = vrot.lane.b32.xlu1 %v2673_v1, %s2592_s13  ;;  %2441 = vrot.lane.b32.xlu0 %v3856_v0, %s2594_s19 }
  0x1d   : > { %2451 = vrot.lane.b32.xlu2 %v2450_v5, %s2593_s18 }
  0x24   : > { %698 = vrot.lane.b32.xlu1 %v2682_v3, %s2591_s12  ;;  %532 = vrot.lane.b32.xlu0 %v2682_v3, %s2595_s20 }
  0x25   : > { %620 = vrot.lane.b32.xlu2 %v2682_v3, %s2592_s13 }
  0x2c   : > { %534 = vrot.lane.b32.xlu1 %v2673_v1, %s2595_s20  ;;  %721 = vrot.lane.b32.xlu0 %v2685_v4, %s2591_s12 }
  0x2d   : > { %493 = vrot.lane.b32.xlu2 %v2673_v1, %s2596_s21 }
  0x34   : > { %491 = vrot.lane.b32.xlu1 %v2682_v3, %s2596_s21  ;;  %579 = vrot.lane.b32.xlu0 %v2682_v3, %s2594_s19 }
  0x35   : > { %2461 = vrot.lane.b32.xlu2 %v2460_v6, %s2597_s22 }
  0x3c   : > { %2456 = vrot.lane.b32.xlu1 %v2455_v8, %s2593_s18  ;;  %643 = vrot.lane.b32.xlu0 %v2685_v4, %s2592_s13 }
  0x3d   : > { %411 = vrot.lane.b32.xlu2 %v2673_v1, %s2598_s23 }
  0x44   : > { %409 = vrot.lane.b32.xlu1 %v2682_v3, %s2598_s23  ;;  %530 = vrot.lane.b32.xlu0 %v3856_v0, %s2595_s20 }
  0x45   : > { %719 = vrot.lane.b32.xlu2 %v2714_v7, %s2591_s12 }
  0x4c   : > { %602 = vrot.lane.b32.xlu1 %v2685_v4, %s2594_s19  ;;  %489 = vrot.lane.b32.xlu0 %v3856_v0, %s2596_s21 }
  0x4d   : > { %553 = vrot.lane.b32.xlu2 %v2714_v7, %s2595_s20 }
  0x54   : > { %2466 = vrot.lane.b32.xlu1 %v2455_v8, %s2597_s22  ;;  %555 = vrot.lane.b32.xlu0 %v2685_v4, %s2595_s20 }
  0x55   : > { %407 = vrot.lane.b32.xlu2 %v3856_v0, %s2598_s23 }
  0x5c   : > { %641 = vrot.lane.b32.xlu1 %v2714_v7, %s2592_s13  ;;  %512 = vrot.lane.b32.xlu0 %v2714_v7, %s2596_s21 }
  0x5d   : > { %600 = vrot.lane.b32.xlu2 %v2714_v7, %s2594_s19 }
  0x64   : > { %514 = vrot.lane.b32.xlu1 %v2685_v4, %s2596_s21  ;;  %471 = vrot.lane.b32.xlu0 %v2685_v4, %s2597_s22 }
  0x65   : > { %432 = vrot.lane.b32.xlu2 %v2685_v4, %s2598_s23 }
  0x67   : > { %v2752_v9 = vpop.permute.xlu2 %2436 }
  0x68   : > { %v2438_v27 = vunpack.i.l.bf16 %v2752_v9  ;;  %v2439_v6 = vunpack.i.h.bf16 %v2752_v9 }
  0x6c   : > { %430 = vrot.lane.b32.xlu1 %v2714_v7, %s2598_s23  ;;  %551 = vrot.lane.b32.xlu0 %v3856_v0, %s2595_s20 }
  0x6d   : > { %467 = vrot.lane.b32.xlu2 %v3856_v0, %s2597_s22 }
  0x6f   : > { %v2760_v10 = vpop.permute.xlu2 %581 }
  0x74   : > { %510 = vrot.lane.b32.xlu1 %v3856_v0, %s2596_s21  ;;  %428 = vrot.lane.b32.xlu0 %v3856_v0, %s2598_s23 }
  0x75   : > { %2477 = vrot.lane.b32.xlu2 %v3856_v0, %s2594_s19 }
  0x77   : > { %v2766_v12 = vpop.permute.xlu2 %2451 }
  0x78   : > { %v2453_v36 = vunpack.i.l.bf16 %v2766_v12  ;;  %v2454_v63 = vunpack.i.h.bf16 %v2766_v12 }
  0x7c   : > { %773 = vperm.xlu1 %2470, %v770_v52   ;;  %2472 = vrot.lane.b32.xlu0 %v3856_v0, %s2592_s13 }
  0x7d   : > { %2492 = vrot.lane.b32.xlu2 %v3856_v0, %s2598_s23 }
  0x7e   : > { %v2432_v15 = vpop.permute.xlu0 %2431 }
  0x7f   : > { %v621_v16 = vpop.permute.xlu2 %620  ;;  %v2433_v18 = vunpack.i.l.bf16 %v2432_v15  ;;  %v2434_v45 = vunpack.i.h.bf16 %v2432_v15 }
  0x84   : > { %2482 = vrot.lane.b32.xlu1 %v3856_v0, %s2595_s20  ;;  %1158 = vrot.lane.b32.xlu0 %v3856_v0, %s2591_s12 }
  0x86   : > { %v2447_v20 = vpop.permute.xlu1 %2446  ;;  %v701_v21 = vpop.permute.xlu0 %700 }
  0x87   : > { %v2449_v22 = vunpack.i.h.bf16 %v2447_v20  ;;  %v2448_v23 = vunpack.i.l.bf16 %v2447_v20  ;;  %v494_v24 = vpop.permute.xlu2 %493  ;;  %v2773_v25 = vsel %vm704_vm0, %v701_v21, %v2433_v18 }
  0x88   : > { %2274 = vmatpush.msk.msra.mxu1 %vm2768_vm1, %v2773_v25 }
  0x89   : > { %v2779_v26 = vsel %vm667_vm2, %v2448_v23, %v2449_v22  ;;  %v2818_v42 = vsel %vm667_vm2, %v2453_v36, %v2448_v23 }
  0x8a   : > { %808 = vmatpush.msra.mxu1 %v2779_v26 }
  0x8c   : > { %2487 = vrot.lane.b32.xlu0 %v3856_v0, %s2596_s21 }
  0x8e   : > { %v623_v29 = vpop.permute.xlu1 %622  ;;  %v2787_v30 = vpop.permute.xlu0 %2441 }
  0x8f   : > { %v2443_v31 = vunpack.i.l.bf16 %v2787_v30  ;;  %v2791_v32 = vsel %vm626_vm3, %v623_v29, %v2438_v27  ;;  %v2793_v33 = vpop.permute.xlu2 %2461  ;;  %v2826_v44 = vsel %vm626_vm3, %v621_v16, %v623_v29  ;;  %v2444_v17 = vunpack.i.h.bf16 %v2787_v30 }
  0x90   : > { %2275 = vmatpush.msk.msra.mxu1 %vm2783_vm4, %v2791_v32  ;;  %v2464_v54 = vunpack.i.h.bf16 %v2793_v33  ;;  %v2463_v55 = vunpack.i.l.bf16 %v2793_v33 }
  0x91   : > { %v2800_v34 = vsel %vm585_vm5, %v2760_v10, %v2443_v31 }
  0x92   : > { %2276 = vmatpush.msk.msra.mxu1 %vm2768_vm1, %v2800_v34  ;;  %v2862_v60 = vsel %vm454_vm10, %v2463_v55, %v2464_v54 }
  0x93   : > { %3895 = vst [vmem:[#allocation7_spill] sm:$0xff] %v2862_v60 }
  0x94   : > { %811 = vmatpush.msra.mxu1 %v2673_v1 }
  0x96   : > { %v699_v38 = vpop.permute.xlu1 %698  ;;  %v533_v39 = vpop.permute.xlu0 %532 }
  0x97   : > { %v412_v40 = vpop.permute.xlu2 %411  ;;  %v2812_v41 = vsel %vm704_vm0, %v699_v38, %v701_v21 }
  0x98   : > { %2268 = vmatpush.msk.msra.mxu0 %vm2807_vm6, %v2812_v41 }
  0x9a   : > { %788 = vmatpush.msra.mxu0 %v2818_v42 }
  0x9c   : > { %2269 = vmatpush.msk.msra.mxu0 %vm2820_vm7, %v2826_v44 }
  0x9e   : > { %v535_v46 = vpop.permute.xlu1 %534  ;;  %v722_v47 = vpop.permute.xlu0 %721 }
  0x9f   : > { %v720_v48 = vpop.permute.xlu2 %719  ;;  %v2832_v49 = vsel %vm536_vm8, %v533_v39, %v535_v46  ;;  %v2835_v50 = vsel %vm704_vm0, %v722_v47, %v2434_v45 }
  0xa0   : > { %3893 = vst [vmem:[#allocation5_spill] sm:$0xff] %v2832_v49  ;;  %2277 = vmatpush.msk.msra.mxu1 %vm2783_vm4, %v2832_v49  ;;  %2286 = vmatpush.msk.msra.mxu3 %vm2768_vm1, %v2835_v50  ;;  %v2844_v51 = vsel %vm704_vm0, %v720_v48, %v722_v47 }
  0xa1   : > { %2280 = vmatpush.msk.msra.mxu2 %vm2807_vm6, %v2844_v51 }
  0xa6   : > { %v492_v56 = vpop.permute.xlu1 %491  ;;  %v580_v57 = vpop.permute.xlu0 %579 }
  0xa7   : > { %v2855_v58 = vsel %vm495_vm9, %v492_v56, %v494_v24  ;;  %v2859_v59 = vsel %vm585_vm5, %v580_v57, %v2760_v10  ;;  %v554_v16 = vpop.permute.xlu2 %553 }
  0xa8   : > { %3894 = vst [vmem:[#allocation6_spill] sm:$0xff] %v2855_v58  ;;  %2278 = vmatpush.msk.msra.mxu1 %vm2768_vm1, %v2855_v58  ;;  %2270 = vmatpush.msk.msra.mxu0 %vm2807_vm6, %v2859_v59 }
  0xaa   : > { %814 = vmatpush.msra.mxu1 %v2862_v60  ;;  %791 = vmatpush.msra.mxu0 %v2682_v3 }
  0xae   : > { %v2457_v61 = vpop.permute.xlu1 %2456  ;;  %v644_v62 = vpop.permute.xlu0 %643 }
  0xaf   : > { %v2459_v2 = vunpack.i.h.bf16 %v2457_v61  ;;  %v2458_v5 = vunpack.i.l.bf16 %v2457_v61  ;;  %v2883_v11 = vsel %vm626_vm3, %v644_v62, %v2439_v6  ;;  %v408_v23 = vpop.permute.xlu2 %407 }
  0xb1   : > { %v2875_v8 = vsel %vm667_vm2, %v2459_v2, %v2454_v63  ;;  %v2878_v10 = vsel %vm667_vm2, %v2454_v63, %v2458_v5 }
  0xb2   : > { %828 = vmatpush.msra.mxu2 %v2875_v8  ;;  %848 = vmatpush.msra.mxu3 %v2878_v10 }
  0xb4   : > { %2287 = vmatpush.msk.msra.mxu3 %vm2783_vm4, %v2883_v11 }
  0xb6   : > { %v410_v12 = vpop.permute.xlu1 %409  ;;  %v531_v9 = vpop.permute.xlu0 %530 }
  0xb7   : > { %v2894_v14 = vsel %vm413_vm11, %v410_v12, %v412_v40  ;;  %v2897_v15 = vsel %vm536_vm8, %v531_v9, %v533_v39  ;;  %v2932_v33 = vsel %vm413_vm11, %v408_v23, %v410_v12  ;;  %v601_v39 = vpop.permute.xlu2 %600 }
  0xb8   : > { %3896 = vst [vmem:[#allocation8_spill] sm:$0xff] %v2894_v14  ;;  %2279 = vmatpush.msk.msra.mxu1 %vm2783_vm4, %v2894_v14  ;;  %2271 = vmatpush.msk.msra.mxu0 %vm2820_vm7, %v2897_v15 }
  0xb9   : > { %2245 = vmatmul.msk.f32.vlgmr.msra.gmra.mxu1 %vm776_vm12, %v2891_v13 }
  0xbe   : > { %v603_v18 = vpop.permute.xlu1 %602  ;;  %v490_v20 = vpop.permute.xlu0 %489 }
  0xbf   : > { %v2909_v21 = vsel %vm585_vm5, %v603_v18, %v2444_v17  ;;  %v2912_v22 = vsel %vm495_vm9, %v490_v20, %v492_v56  ;;  %v2950_v40 = vsel %vm585_vm5, %v601_v39, %v603_v18  ;;  %v433_v53 = vpop.permute.xlu2 %432 }
  0xc0   : > { %2288 = vmatpush.msk.msra.mxu3 %vm2768_vm1, %v2909_v21  ;;  %2272 = vmatpush.msk.msra.mxu0 %vm2807_vm6, %v2912_v22 }
  0xc2   : > { %851 = vmatpush.msra.mxu3 %v2685_v4 }
  0xc6   : > { %v2467_v24 = vpop.permute.xlu1 %2466  ;;  %v556_v27 = vpop.permute.xlu0 %555 }
  0xc7   : > { %v2468_v29 = vunpack.i.l.bf16 %v2467_v24  ;;  %v2922_v30 = vsel %vm536_vm8, %v554_v16, %v556_v27  ;;  %v2469_v45 = vunpack.i.h.bf16 %v2467_v24  ;;  %v468_v61 = vpop.permute.xlu2 %467 }
  0xc8   : > { %2289 = vmatpush.msk.msra.mxu3 %vm2783_vm4, %v2922_v30 }
  0xc9   : > { %v2928_v31 = vsel %vm454_vm10, %v2468_v29, %v2463_v55  ;;  %v2991_v5 = vsel %vm454_vm10, %v468_v61, %v2469_v45 }
  0xca   : > { %794 = vmatpush.msra.mxu0 %v2928_v31  ;;  %3900 = vst [vmem:[#allocation12_spill] sm:$0xff] %v2991_v5 }
  0xcc   : > { %2273 = vmatpush.msk.msra.mxu0 %vm2820_vm7, %v2932_v33 }
  0xcd   : > { %2244 = vmatmul.msk.f32.vlgmr.msra.gmra.mxu0 %vm776_vm12, %v2891_v13 }
  0xce   : > { %v642_v35 = vpop.permute.xlu1 %641  ;;  %v513_v36 = vpop.permute.xlu0 %512 }
  0xcf   : > { %v2940_v38 = vsel %vm626_vm3, %v642_v35, %v644_v62 }
  0xd0   : > { %2281 = vmatpush.msk.msra.mxu2 %vm2820_vm7, %v2940_v38 }
  0xd1   : > { %v3935_v28 = vld [vmem:[#allocation12_spill] sm:$0xff] }
  0xd2   : > { %2282 = vmatpush.msk.msra.mxu2 %vm2807_vm6, %v2950_v40 }
  0xd4   : > { %831 = vmatpush.msra.mxu2 %v2714_v7 }
  0xd6   : > { %v515_v46 = vpop.permute.xlu1 %514  ;;  %v472_v47 = vpop.permute.xlu0 %471 }
  0xd7   : > { %v2957_v48 = vsel %vm495_vm9, %v513_v36, %v515_v46  ;;  %v2960_v52 = vsel %vm454_vm10, %v2469_v45, %v472_v47 }
  0xd8   : > { %2290 = vmatpush.msk.msra.mxu3 %vm2768_vm1, %v2957_v48 }
  0xda   : > { %854 = vmatpush.msra.mxu3 %v2960_v52 }
  0xde   : > { %v431_v54 = vpop.permute.xlu1 %430  ;;  %v552_v55 = vpop.permute.xlu0 %551 }
  0xdf   : > { %v2969_v56 = vsel %vm413_vm11, %v431_v54, %v433_v53  ;;  %v2972_v57 = vsel %vm536_vm8, %v552_v55, %v554_v16  ;;  %v3060_v53 = vpop.permute.xlu2 %2477 }
  0xe0   : > { %3897 = vst [vmem:[#allocation9_spill] sm:$0xff] %v2969_v56  ;;  %2291 = vmatpush.msk.msra.mxu3 %vm2783_vm4, %v2969_v56  ;;  %2283 = vmatpush.msk.msra.mxu2 %vm2820_vm7, %v2972_v57 }
  0xe1   : > { %3898 = vst [vmem:[#allocation10_spill] sm:$0xff] %v2972_v57  ;;  %2247 = vmatmul.msk.f32.vlgmr.msra.gmra.mxu3 %vm776_vm12, %v2891_v13 }
  0xe6   : > { %v511_v62 = vpop.permute.xlu1 %510  ;;  %v429_v2 = vpop.permute.xlu0 %428 }
  0xe7   : > { %v2985_v63 = vsel %vm495_vm9, %v511_v62, %v513_v36  ;;  %v2995_v6 = vsel %vm413_vm11, %v429_v2, %v431_v54  ;;  %v3068_v54 = vpop.permute.xlu2 %2492 }
  0xe8   : > { %3899 = vst [vmem:[#allocation11_spill] sm:$0xff] %v2985_v63  ;;  %2284 = vmatpush.msk.msra.mxu2 %vm2807_vm6, %v2985_v63 }
  0xe9   : > { %3901 = vst [vmem:[#allocation13_spill] sm:$0xff] %v2995_v6 }
  0xea   : > { %834 = vmatpush.msra.mxu2 %v2991_v5 }
  0xec   : > { %2285 = vmatpush.msk.msra.mxu2 %vm2820_vm7, %v2995_v6 }
  0xed   : > { %2246 = vmatmul.msk.f32.vlgmr.msra.gmra.mxu2 %vm776_vm12, %v2891_v13 }
  0xee   : > { %v774_v12 = vpop.permute.xlu1 %773  ;;  %v3077_v61 = vpop.permute.xlu0 %2472 }
  0xef   : > { %v2474_v62 = vunpack.i.l.bf16 %v3077_v61  ;;  %v3934_v19 = vld [vmem:[#allocation11_spill] sm:$0xff] }
 0x136   : > { %v817_v9 = vpop.f32.mrf.mxu1 }
 0x137   : > { %v818_v16 = vadd.f32 %v817_v9, %v774_v12  ;;  %v3094_v9 = vpop.permute.xlu1 %2482 }
 0x139   : > { %v3006_v17 = vmax.f32 %v818_v16, 0.0  ;;  %v1262_v16 = vld [vmem:[%s3850_s4] sm:$0xff] }
 0x13b   : > { %3902 = vst [vmem:[#allocation14_spill] sm:$0xff] %v3006_v17  ;;  %1040 = vrot.lane.b32.xlu1 %v3006_v17, %s2594_s19  ;;  %1080 = vrot.lane.b32.xlu2 %v3006_v17, %s2592_s13  ;;  %v2501_v29 = vpack.i.bf16 0.0, %v3006_v17 }
 0x142   : > { %v3938_v43 = vld [vmem:[#allocation14_spill] sm:$0xff] }
 0x143   : > { %994 = vrot.lane.b32.xlu1 %v3006_v17, %s2595_s20 }
 0x14a   : > { %v797_v13 = vpop.f32.mrf.mxu0 }
 0x14b   : > { %v798_v18 = vadd.f32 %v797_v13, %v774_v12 }
 0x14d   : > { %v3014_v20 = vmax.f32 %v798_v18, 0.0  ;;  %v2479_v18 = vunpack.i.l.bf16 %v3060_v53 }
 0x14f   : > { %3903 = vst [vmem:[#allocation15_spill] sm:$0xff] %v3014_v20  ;;  %952 = vrot.lane.b32.xlu2 %v3014_v20, %s2596_s21  ;;  %992 = vrot.lane.b32.xlu0 %v3014_v20, %s2595_s20  ;;  %v2496_v23 = vpack.i.bf16 %v3006_v17, %v3014_v20 }
 0x151   : > { %2497 = vrot.lane.b32.xlu1 %v2496_v23, %s2597_s22 }
 0x157   : > { %876 = vrot.lane.b32.xlu2 %v3014_v20, %s2598_s23  ;;  %954 = vrot.lane.b32.xlu0 %v3006_v17, %s2596_s21 }
 0x159   : > { %1078 = vrot.lane.b32.xlu1 %v3014_v20, %s2592_s13 }
 0x15f   : > { %1156 = vrot.lane.b32.xlu2 %v3006_v17, %s2591_s12  ;;  %878 = vrot.lane.b32.xlu0 %v3006_v17, %s2598_s23 }
 0x161   : > { %1038 = vrot.lane.b32.xlu1 %v3014_v20, %s2594_s19 }
 0x164   : > { %v857_v24 = vpop.f32.mrf.mxu3 }
 0x165   : > { %v858_v27 = vadd.f32 %v857_v24, %v774_v12  ;;  %v1159_v24 = vpop.permute.xlu0 %1158 }
 0x167   : > { %v3036_v35 = vmax.f32 %v858_v27, 0.0  ;;  %2502 = vrot.lane.b32.xlu2 %v2501_v29, %s2593_s18 }
 0x169   : > { %1100 = vrot.lane.b32.xlu0 %v3036_v35, %s2592_s13  ;;  %v2511_v47 = vpack.i.bf16 0.0, %v3036_v35 }
 0x16f   : > { %1060 = vrot.lane.b32.xlu2 %v3036_v35, %s2594_s19 }
 0x170   : > { %v837_v36 = vpop.f32.mrf.mxu2 }
 0x171   : > { %v838_v39 = vadd.f32 %v837_v36, %v774_v12  ;;  %1014 = vrot.lane.b32.xlu0 %v3036_v35, %s2595_s20  ;;  %v3109_v36 = vpop.permute.xlu0 %2487 }
 0x173   : > { %v3045_v45 = vmax.f32 %v838_v39, 0.0 }
 0x175   : > { %v2506_v46 = vpack.i.bf16 %v3045_v45, %v3856_v0  ;;  %v2516_v55 = vpack.i.bf16 %v3036_v35, %v3045_v45 }
 0x177   : > { %2507 = vrot.lane.b32.xlu1 %v2506_v46, %s2597_s22  ;;  %1012 = vrot.lane.b32.xlu2 %v3045_v45, %s2595_s20 }
 0x179   : > { %972 = vrot.lane.b32.xlu0 %v3045_v45, %s2596_s21 }
 0x17f   : > { %1098 = vrot.lane.b32.xlu1 %v3045_v45, %s2592_s13  ;;  %1058 = vrot.lane.b32.xlu2 %v3045_v45, %s2594_s19 }
 0x181   : > { %2512 = vrot.lane.b32.xlu0 %v2511_v47, %s2597_s22 }
 0x187   : > { %974 = vrot.lane.b32.xlu1 %v3036_v35, %s2596_s21  ;;  %898 = vrot.lane.b32.xlu2 %v3036_v35, %s2598_s23 }
 0x189   : > { %1174 = vrot.lane.b32.xlu0 %v3045_v45, %s2591_s12 }
 0x18f   : > { %896 = vrot.lane.b32.xlu1 %v3045_v45, %s2598_s23  ;;  %2517 = vrot.lane.b32.xlu2 %v2516_v55, %s2593_s18 }
 0x191   : > { %1154 = vrot.lane.b32.xlu0 %v3014_v20, %s2591_s12 }
 0x195   : > { %v1081_v2 = vpop.permute.xlu2 %1080 }
 0x196   : > { %v3081_v12 = vsel %vm626_vm3, %v1081_v2, %v2474_v62 }
 0x197   : > { %3904 = vst [vmem:[#allocation16_spill] sm:$0xff] %v3081_v12  ;;  %1176 = vrot.lane.b32.xlu1 %v3036_v35, %s2591_s12  ;;  %2304 = vmatpush.msk.msrb.mxu2 %vm2783_vm4, %v3081_v12 }
 0x198   : > { %1178 = vrot.lane.b32.xlu2 %v3856_v0, %s2591_s12 }
 0x199   : > { %1140 = vrot.lane.b32.xlu0 %v3856_v0, %s2593_s18 }
 0x19f   : > { %1118 = vrot.lane.b32.xlu1 %v3014_v20, %s2593_s18 }
 0x1a7   : > { %1265 = vperm.xlu1 %2470, %v1262_v16  }
 0x1a9   : > { %v953_v13 = vpop.permute.xlu2 %952 }
 0x1ad   : > { %v1041_v23 = vpop.permute.xlu1 %1040 }
 0x1ae   : > { %v3101_v27 = vsel %vm585_vm5, %v1041_v23, %v2479_v18 }
 0x1af   : > { %3905 = vst [vmem:[#allocation17_spill] sm:$0xff] %v3101_v27  ;;  %2305 = vmatpush.msk.msrb.mxu2 %vm2768_vm1, %v3101_v27 }
 0x1b1   : > { %v3106_v29 = vpop.permute.xlu2 %876  ;;  %1313 = vmatpush.msrb.mxu2 %v3006_v17 }
 0x1b5   : > { %v995_v46 = vpop.permute.xlu1 %994 }
 0x1b9   : > { %v3111_v39 = vpop.permute.xlu2 %1156 }
 0x1ba   : > { %v3115_v47 = vsel %vm704_vm0, %v3111_v39, %v1159_v24 }
 0x1bb   : > { %3906 = vst [vmem:[#allocation18_spill] sm:$0xff] %v3115_v47  ;;  %2315 = vmatpush.msk.msrb.mxu3 %vm2768_vm1, %v3115_v47  ;;  %v3139_v47 = vld [vmem:[%s3849_s3 + $0x8] sm:$0xff] }
 0x1c1   : > { %v3120_v55 = vpop.permute.xlu2 %2502  ;;  %v993_v62 = vpop.permute.xlu0 %992 }
 0x1c2   : > { %v2505_v16 = vunpack.i.h.bf16 %v3120_v55  ;;  %v3866_v18 = vunpack.i.l.bf16 %v3120_v55  ;;  %v3125_v0 = vsel %vm536_vm8, %v993_v62, %v995_v46 }
 0x1c3   : > { %3907 = vst [vmem:[#allocation19_spill] sm:$0xff] %v3125_v0  ;;  %v2498_v17 = vpop.permute.xlu1 %2497  ;;  %2306 = vmatpush.msk.msrb.mxu2 %vm2783_vm4, %v3125_v0 }
 0x1c4   : > { %v3133_v24 = vsel %vm667_vm2, %v3866_v18, %v2505_v16  ;;  %v2500_v27 = vunpack.i.h.bf16 %v2498_v17  ;;  %v2499_v46 = vunpack.i.l.bf16 %v2498_v17 }
 0x1c5   : > { %3908 = vst [vmem:[#allocation20_spill] sm:$0xff] %v3133_v24  ;;  %1346 = vmatpush.msrb.mxu3 %v3133_v24 }
 0x1c6   : > { %2249 = vmatmul.msk.f32.vlgmr.msrb.gmra.mxu3 %vm454_vm10, %v3139_v47  ;;  %v3151_v18 = vsel %vm454_vm10, %v2499_v46, %v2500_v27  ;;  %v2489_v27 = vunpack.i.l.bf16 %v3109_v36 }
 0x1c9   : > { %v955_v12 = vpop.permute.xlu0 %954 }
 0x1ca   : > { %v3144_v0 = vsel %vm495_vm9, %v953_v13, %v955_v12 }
 0x1cb   : > { %v1079_v6 = vpop.permute.xlu1 %1078  ;;  %2307 = vmatpush.msk.msrb.mxu2 %vm2768_vm1, %v3144_v0 }
 0x1cc   : > { %v1084_v16 = vsel %vm626_vm3, %v1079_v6, %v1081_v2  ;;  %v2484_v2 = vunpack.i.l.bf16 %v3094_v9 }
 0x1cd   : > { %2292 = vmatpush.msk.msrb.mxu0 %vm2820_vm7, %v1084_v16  ;;  %1316 = vmatpush.msrb.mxu2 %v3151_v18 }
 0x1d1   : > { %v879_v17 = vpop.permute.xlu0 %878 }
 0x1d2   : > { %v3158_v12 = vsel %vm413_vm11, %v3106_v29, %v879_v17  ;;  %v3171_v17 = vpop.permute.xlu2 %1060 }
 0x1d3   : > { %3909 = vst [vmem:[#allocation21_spill] sm:$0xff] %v3158_v12  ;;  %v1039_v24 = vpop.permute.xlu1 %1038  ;;  %2308 = vmatpush.msk.msrb.mxu2 %vm2783_vm4, %v3158_v12  ;;  %v996_v12 = vsel %vm536_vm8, %v2484_v2, %v993_v62  ;;  %v3204_v2 = vld [vmem:[%s3849_s3] sm:$0xff] }
 0x1d4   : > { %v1044_v6 = vsel %vm585_vm5, %v1039_v24, %v1041_v23  ;;  %v956_v23 = vsel %vm495_vm9, %v2489_v27, %v953_v13 }
 0x1d5   : > { %2293 = vmatpush.msk.msrb.mxu0 %vm2807_vm6, %v1044_v6  ;;  %2309 = vmatpush.msk.msrb.mxu2 %vm2768_vm1, %v2773_v25 }
 0x1d7   : > { %1273 = vmatpush.msrb.mxu0 %v3014_v20  ;;  %1319 = vmatpush.msrb.mxu2 %v2779_v26 }
 0x1d9   : > { %2294 = vmatpush.msk.msrb.mxu0 %vm2820_vm7, %v996_v12  ;;  %2310 = vmatpush.msk.msrb.mxu2 %vm2783_vm4, %v2791_v32 }
 0x1da   : > { %v3193_v62 = vpop.permute.xlu2 %1012 }
 0x1db   : > { %2295 = vmatpush.msk.msrb.mxu0 %vm2807_vm6, %v956_v23  ;;  %2311 = vmatpush.msk.msrb.mxu2 %vm2768_vm1, %v2800_v34  ;;  %v3187_v24 = vpop.permute.xlu0 %1100 }
 0x1dd   : > { %1322 = vmatpush.msrb.mxu2 %v2673_v1 }
 0x1df   : > { %2312 = vmatpush.msk.msrb.mxu2 %vm2783_vm4, %v2832_v49 }
 0x1e1   : > { %2313 = vmatpush.msk.msrb.mxu2 %vm2768_vm1, %v2855_v58 }
 0x1e2   : > { %v3218_v49 = vpop.permute.xlu2 %1058 }
 0x1e3   : > { %1325 = vmatpush.msrb.mxu2 %v2862_v60  ;;  %v3199_v13 = vpop.permute.xlu0 %1014  ;;  %v2494_v60 = vunpack.i.l.bf16 %v3068_v54 }
 0x1e5   : > { %2314 = vmatpush.msk.msrb.mxu2 %vm2783_vm4, %v2894_v14 }
 0x1e6   : > { %1327 = vmatmul.f32.vlgmr.msrb.gmra.mxu2 %v3204_v2 }
 0x1e7   : > { %2340 = vmatpush.msk.msra.mxu2 %vm2820_vm7, %v1084_v16  ;;  %v880_v16 = vsel %vm413_vm11, %v2494_v60, %v3106_v29 }
 0x1e9   : > { %2341 = vmatpush.msk.msra.mxu2 %vm2807_vm6, %v1044_v6  ;;  %v3214_v27 = vpop.permute.xlu1 %2507 }
 0x1ea   : > { %v2509_v58 = vunpack.i.l.bf16 %v3214_v27  ;;  %v3240_v60 = vpop.permute.xlu2 %898 }
 0x1eb   : > { %1881 = vmatpush.msra.mxu2 %v3014_v20  ;;  %v3221_v1 = vpop.permute.xlu0 %972 }
 0x1ec   : > { %v920_v14 = vsel %vm454_vm10, %v2509_v58, %v2499_v46 }
 0x1ed   : > { %2342 = vmatpush.msk.msra.mxu2 %vm2820_vm7, %v996_v12  ;;  %1276 = vmatpush.msrb.mxu0 %v920_v14 }
 0x1ef   : > { %2343 = vmatpush.msk.msra.mxu2 %vm2807_vm6, %v956_v23  ;;  %2296 = vmatpush.msk.msrb.mxu0 %vm2820_vm7, %v880_v16 }
 0x1f1   : > { %1884 = vmatpush.msra.mxu2 %v920_v14  ;;  %v1099_v6 = vpop.permute.xlu1 %1098  ;;  %2297 = vmatpush.msk.msrb.mxu0 %vm2807_vm6, %v2812_v41 }
 0x1f3   : > { %2344 = vmatpush.msk.msra.mxu2 %vm2820_vm7, %v880_v16  ;;  %1279 = vmatpush.msrb.mxu0 %v2818_v42  ;;  %v3238_v58 = vpop.permute.xlu0 %2512 }
 0x1f5   : > { %2345 = vmatpush.msk.msra.mxu2 %vm2807_vm6, %v2812_v41  ;;  %2298 = vmatpush.msk.msrb.mxu0 %vm2820_vm7, %v2826_v44 }
 0x1f7   : > { %1887 = vmatpush.msra.mxu2 %v2818_v42  ;;  %2299 = vmatpush.msk.msrb.mxu0 %vm2807_vm6, %v2859_v59  ;;  %v2518_v42 = vpop.permute.xlu2 %2517 }
 0x1f8   : > { %v2519_v29 = vunpack.i.l.bf16 %v2518_v42 }
 0x1f9   : > { %2346 = vmatpush.msk.msra.mxu2 %vm2820_vm7, %v2826_v44  ;;  %1282 = vmatpush.msrb.mxu0 %v2682_v3  ;;  %v975_v14 = vpop.permute.xlu1 %974 }
 0x1fb   : > { %2347 = vmatpush.msk.msra.mxu2 %vm2807_vm6, %v2859_v59  ;;  %2300 = vmatpush.msk.msrb.mxu0 %vm2820_vm7, %v2897_v15  ;;  %v1175_v41 = vpop.permute.xlu0 %1174 }
 0x1fd   : > { %1890 = vmatpush.msra.mxu2 %v2682_v3  ;;  %2301 = vmatpush.msk.msrb.mxu0 %vm2807_vm6, %v2912_v22 }
 0x1ff   : > { %2348 = vmatpush.msk.msra.mxu2 %vm2820_vm7, %v2897_v15  ;;  %1285 = vmatpush.msrb.mxu0 %v2928_v31  ;;  %v1179_v15 = vpop.permute.xlu2 %1178 }
 0x201   : > { %2349 = vmatpush.msk.msra.mxu2 %vm2807_vm6, %v2912_v22  ;;  %2302 = vmatpush.msk.msrb.mxu0 %vm2820_vm7, %v2932_v33  ;;  %v897_v3 = vpop.permute.xlu1 %896  ;;  %v2520_v22 = vunpack.i.h.bf16 %v2518_v42 }
 0x202   : > { %1287 = vmatmul.f32.vlgmr.msrb.gmra.mxu0 %v3204_v2 }
 0x203   : > { %1893 = vmatpush.msra.mxu2 %v2928_v31  ;;  %v1155_v44 = vpop.permute.xlu0 %1154  ;;  %v3302_v23 = vsel %vm667_vm2, %v2519_v29, %v2520_v22  ;;  %v2514_v29 = vunpack.i.l.bf16 %v3238_v58 }
 0x204   : > { %v3280_v59 = vsel %vm704_vm0, %v1155_v44, %v3111_v39  ;;  %v2475_v39 = vunpack.i.h.bf16 %v3077_v61  ;;  %3910 = vst [vmem:[#allocation22_spill] sm:$0xff] %v3302_v23  ;;  %v3912_v44 = vunpack.i.l.bf16 %v3120_v55  ;;  %v2510_v55 = vunpack.i.h.bf16 %v3214_v27 }
 0x205   : > { %2350 = vmatpush.msk.msra.mxu2 %vm2820_vm7, %v2932_v33  ;;  %2303 = vmatpush.msk.msrb.mxu1 %vm2807_vm6, %v3280_v59  ;;  %v2485_v27 = vunpack.i.h.bf16 %v3094_v9 }
 0x206   : > { %v3310_v61 = vsel %vm626_vm3, %v3187_v24, %v2475_v39 }
 0x209   : > { %v1177_v46 = vpop.permute.xlu1 %1176 }
 0x20a   : > { %v3289_v12 = vsel %vm704_vm0, %v1175_v41, %v1177_v46  ;;  %v3292_v31 = vsel %vm704_vm0, %v1177_v46, %v1179_v15  ;;  %v2480_v41 = vunpack.i.h.bf16 %v3060_v53  ;;  %v3343_v46 = vsel %vm626_vm3, %v1099_v6, %v3187_v24 }
 0x20b   : > { %2327 = vmatpush.msk.msra.mxu3 %vm2807_vm6, %v3289_v12  ;;  %2339 = vmatpush.msk.msra.mxu0 %vm2768_vm1, %v3292_v31  ;;  %v1141_v33 = vpop.permute.xlu0 %1140  ;;  %v3361_v24 = vsel %vm585_vm5, %v3218_v49, %v3171_v17  ;;  %v3376_v6 = vsel %vm413_vm11, %v897_v3, %v3240_v60  ;;  %v2490_v49 = vunpack.i.h.bf16 %v3109_v36  ;;  %v2495_v36 = vunpack.i.h.bf16 %v3068_v54  ;;  %v3915_v54 = vld [vmem:[#allocation17_spill] sm:$0xff]  ;;  %v3917_v60 = vld [vmem:[#allocation19_spill] sm:$0xff] }
 0x20c   : > { %v3305_v16 = vsel %vm667_vm2, %v2520_v22, %v1141_v33  ;;  %v3321_v42 = vsel %vm585_vm5, %v3171_v17, %v2480_v41  ;;  %v3337_v22 = vsel %vm536_vm8, %v3193_v62, %v3199_v13  ;;  %v3353_v13 = vsel %vm495_vm9, %v3221_v1, %v975_v14 }
 0x20d   : > { %3911 = vst [vmem:[#allocation23_spill] sm:$0xff] %v3305_v16  ;;  %1386 = vmatpush.msra.mxu3 %v3302_v23  ;;  %1426 = vmatpush.msra.mxu0 %v3305_v16  ;;  %v3382_v17 = vsel %vm536_vm8, %v2485_v27, %v3193_v62  ;;  %v2515_v14 = vunpack.i.h.bf16 %v3238_v58  ;;  %v3393_v9 = vsel %vm495_vm9, %v2490_v49, %v3221_v1  ;;  %v3916_v58 = vld [vmem:[#allocation14_spill] sm:$0xff] }
 0x20e   : > { %2251 = vmatmul.msk.f32.vlgmr.msra.gmra.mxu0 %vm454_vm10, %v3139_v47  ;;  %2250 = vmatmul.msk.f32.vlgmr.msra.gmra.mxu3 %vm454_vm10, %v3139_v47  ;;  %v3408_v1 = vsel %vm413_vm11, %v2495_v36, %v897_v3  ;;  %v3921_v3 = vld [vmem:[#allocation6_spill] sm:$0xff] }
 0x20f   : > { %2328 = vmatpush.msk.msrb.mxu3 %vm2783_vm4, %v3310_v61  ;;  %v3403_v62 = vsel %vm454_vm10, %v2515_v14, %v2510_v55 }
 0x211   : > { %2329 = vmatpush.msk.msrb.mxu3 %vm2768_vm1, %v3321_v42  ;;  %v1119_v53 = vpop.permute.xlu1 %1118 }
 0x212   : > { %v3332_v15 = vsel %vm667_vm2, %v1119_v53, %v3912_v44 }
 0x213   : > { %1393 = vmatpush.msrb.mxu3 %v3036_v35  ;;  %1306 = vmatpush.msrb.mxu1 %v3332_v15 }
 0x214   : > { %2248 = vmatmul.msk.f32.vlgmr.msrb.gmra.mxu1 %vm454_vm10, %v3139_v47  ;;  %v3370_v47 = vsel %vm454_vm10, %v2510_v55, %v2514_v29 }
 0x215   : > { %2330 = vmatpush.msk.msrb.mxu3 %vm2783_vm4, %v3337_v22  ;;  %2316 = vmatpush.msk.msra.mxu1 %vm2820_vm7, %v3343_v46 }
 0x217   : > { %2331 = vmatpush.msk.msrb.mxu3 %vm2768_vm1, %v3353_v13  ;;  %2317 = vmatpush.msk.msra.mxu1 %vm2807_vm6, %v3361_v24 }
 0x219   : > { %1396 = vmatpush.msrb.mxu3 %v3370_v47  ;;  %1353 = vmatpush.msra.mxu1 %v3045_v45  ;;  %v1266_v39 = vpop.permute.xlu1 %1265 }
 0x21b   : > { %2332 = vmatpush.msk.msrb.mxu3 %vm2783_vm4, %v3376_v6  ;;  %2318 = vmatpush.msk.msra.mxu1 %vm2820_vm7, %v3382_v17 }
 0x21d   : > { %2333 = vmatpush.msk.msrb.mxu3 %vm2768_vm1, %v2835_v50  ;;  %2319 = vmatpush.msk.msra.mxu1 %vm2807_vm6, %v3393_v9 }
 0x21f   : > { %1399 = vmatpush.msrb.mxu3 %v2878_v10  ;;  %1356 = vmatpush.msra.mxu1 %v3403_v62 }
 0x221   : > { %2334 = vmatpush.msk.msrb.mxu3 %vm2783_vm4, %v2883_v11  ;;  %2320 = vmatpush.msk.msra.mxu1 %vm2820_vm7, %v3408_v1 }
 0x223   : > { %2335 = vmatpush.msk.msrb.mxu3 %vm2768_vm1, %v2909_v21  ;;  %2321 = vmatpush.msk.msra.mxu1 %vm2807_vm6, %v2844_v51 }
 0x225   : > { %1402 = vmatpush.msrb.mxu3 %v2685_v4  ;;  %1359 = vmatpush.msra.mxu1 %v2875_v8  ;;  %v3913_v4 = vld [vmem:[#allocation13_spill] sm:$0xff] }
 0x227   : > { %2336 = vmatpush.msk.msrb.mxu3 %vm2783_vm4, %v2922_v30  ;;  %2322 = vmatpush.msk.msra.mxu1 %vm2820_vm7, %v2940_v38 }
 0x229   : > { %2337 = vmatpush.msk.msrb.mxu3 %vm2768_vm1, %v2957_v48  ;;  %2323 = vmatpush.msk.msra.mxu1 %vm2807_vm6, %v2950_v40 }
 0x22b   : > { %1405 = vmatpush.msrb.mxu3 %v2960_v52  ;;  %1362 = vmatpush.msra.mxu1 %v2714_v7  ;;  %v3914_v7 = vld [vmem:[#allocation16_spill] sm:$0xff] }
 0x22d   : > { %2338 = vmatpush.msk.msrb.mxu3 %vm2783_vm4, %v2969_v56  ;;  %2324 = vmatpush.msk.msra.mxu1 %vm2820_vm7, %v2972_v57 }
 0x22e   : > { %1407 = vmatmul.f32.vlgmr.msrb.gmra.mxu3 %v3204_v2 }
 0x22f   : > { %2325 = vmatpush.msk.msra.mxu1 %vm2807_vm6, %v2985_v63 }
 0x231   : > { %1365 = vmatpush.msra.mxu1 %v2991_v5 }
 0x233   : > { %2326 = vmatpush.msk.msra.mxu1 %vm2820_vm7, %v3913_v4 }
 0x234   : > { %1367 = vmatmul.f32.vlgmr.msra.gmra.mxu1 %v3204_v2  ;;  %v3918_v2 = vld [vmem:[#allocation21_spill] sm:$0xff] }
 0x235   : > { %2358 = vmatpush.msk.msrb.mxu1 %vm2783_vm4, %v3914_v7 }
 0x237   : > { %2359 = vmatpush.msk.msrb.mxu1 %vm2768_vm1, %v3915_v54 }
 0x239   : > { %1921 = vmatpush.msrb.mxu1 %v3916_v58 }
 0x23b   : > { %2360 = vmatpush.msk.msrb.mxu1 %vm2783_vm4, %v3917_v60 }
 0x23d   : > { %2361 = vmatpush.msk.msrb.mxu1 %vm2768_vm1, %v3144_v0  ;;  %v3919_v0 = vld [vmem:[#allocation4_spill] sm:$0xff] }
 0x23f   : > { %1924 = vmatpush.msrb.mxu1 %v3151_v18  ;;  %v3920_v18 = vld [vmem:[#allocation5_spill] sm:$0xff] }
 0x241   : > { %2362 = vmatpush.msk.msrb.mxu1 %vm2783_vm4, %v3918_v2 }
 0x243   : > { %2363 = vmatpush.msk.msrb.mxu1 %vm2768_vm1, %v2773_v25  ;;  %v3922_v25 = vmov 0.0  }
 0x244   : > { %2532 = vrot.lane.b32.xlu2 %v3922_v25, %s2594_s19  ;;  %2547 = vrot.lane.b32.xlu1 %v3922_v25, %s2597_s22 }
 0x245   : > { %1927 = vmatpush.msrb.mxu1 %v2779_v26  ;;  %v3923_v26 = vld [vmem:[#allocation7_spill] sm:$0xff]  ;;  %2522 = vrot.lane.b32.xlu0 %v3922_v25, %s2591_s12 }
 0x247   : > { %2364 = vmatpush.msk.msrb.mxu1 %vm2783_vm4, %v2791_v32  ;;  %v3924_v32 = vld [vmem:[#allocation8_spill] sm:$0xff] }
 0x249   : > { %2365 = vmatpush.msk.msrb.mxu1 %vm2768_vm1, %v2800_v34  ;;  %v1348_v27 = vpop.f32.mrf.mxu3 }
 0x24b   : > { %1930 = vmatpush.msrb.mxu1 %v3919_v0 }
 0x24c   : > { %2537 = vrot.lane.b32.xlu2 %v3922_v25, %s2595_s20  ;;  %1445 = vrot.lane.b32.xlu1 %v3922_v25, %s2598_s23 }
 0x24d   : > { %2366 = vmatpush.msk.msrb.mxu1 %vm2783_vm4, %v3920_v18  ;;  %2527 = vrot.lane.b32.xlu0 %v3922_v25, %s2592_s13 }
 0x24f   : > { %2367 = vmatpush.msk.msrb.mxu1 %vm2768_vm1, %v3921_v3 }
 0x251   : > { %1933 = vmatpush.msrb.mxu1 %v3923_v26 }
 0x253   : > { %2368 = vmatpush.msk.msrb.mxu1 %vm2783_vm4, %v3924_v32 }
 0x254   : > { %2542 = vrot.lane.b32.xlu2 %v3922_v25, %s2596_s21 }
 0x269   : > { %v1328_v29 = vpop.f32.mrf.mxu2 }
 0x26a   : > { %v1329_v55 = vadd.f32 %v1328_v29, %v1266_v39 }
 0x26c   : > { %v1349_v49 = vadd.f32 %v1348_v27, %v1329_v55  ;;  %v2056_v27 = vld [vmem:[%s3854_s8] sm:$0xff] }
 0x26e   : > { %v3519_v14 = vmax.f32 %v1349_v49, 0.0 }
 0x270   : > { %3925 = vst [vmem:[#allocation16_spill] sm:$0xff] %v3519_v14  ;;  %v2551_v36 = vpack.i.bf16 0.0, %v3519_v14 }
 0x27f   : > { %v1288_v34 = vpop.f32.mrf.mxu0 }
 0x280   : > { %v1289_v33 = vadd.f32 %v1288_v34, %v1266_v39 }
 0x28b   : > { %v1428_v18 = vpop.f32.mrf.mxu0 }
 0x291   : > { %v1308_v41 = vpop.f32.mrf.mxu1  ;;  %v1388_v7 = vpop.f32.mrf.mxu3 }
 0x292   : > { %v1309_v53 = vadd.f32 %v1308_v41, %v1289_v33 }
 0x294   : > { %v3505_v44 = vmax.f32 %v1309_v53, 0.0 }
 0x296   : > { %1649 = vrot.lane.b32.xlu1 %v3505_v44, %s2592_s13  ;;  %1563 = vrot.lane.b32.xlu2 %v3505_v44, %s2595_s20  ;;  %v2561_v26 = vpack.i.bf16 %v3519_v14, %v3505_v44 }
 0x297   : > { %1725 = vrot.lane.b32.xlu0 %v3505_v44, %s2591_s12 }
 0x29e   : > { %1609 = vrot.lane.b32.xlu1 %v3505_v44, %s2594_s19  ;;  %1523 = vrot.lane.b32.xlu2 %v3505_v44, %s2596_s21  ;;  %v3563_v53 = vpop.permute.xlu2 %2532 }
 0x29f   : > { %1447 = vrot.lane.b32.xlu0 %v3505_v44, %s2598_s23 }
 0x2a6   : > { %2552 = vrot.lane.b32.xlu1 %v2551_v36, %s2593_s18  ;;  %1727 = vrot.lane.b32.xlu2 %v3519_v14, %s2591_s12  ;;  %v3572_v55 = vpop.permute.xlu2 %2537 }
 0x2a7   : > { %1565 = vrot.lane.b32.xlu0 %v3519_v14, %s2595_s20  ;;  %v2539_v36 = vunpack.i.l.bf16 %v3572_v55 }
 0x2ae   : > { %1611 = vrot.lane.b32.xlu1 %v3519_v14, %s2594_s19  ;;  %1651 = vrot.lane.b32.xlu2 %v3519_v14, %s2592_s13  ;;  %v3583_v49 = vpop.permute.xlu2 %2542 }
 0x2af   : > { %1525 = vrot.lane.b32.xlu0 %v3519_v14, %s2596_s21 }
 0x2b1   : > { %v1408_v54 = vpop.f32.mrf.mxu3  ;;  %v1368_v60 = vpop.f32.mrf.mxu1 }
 0x2b2   : > { %v1369_v2 = vadd.f32 %v1368_v60, %v1266_v39  ;;  %v1409_v0 = vadd.f32 %v1408_v54, %v1266_v39 }
 0x2b4   : > { %v1389_v3 = vadd.f32 %v1388_v7, %v1369_v2  ;;  %v1429_v34 = vadd.f32 %v1428_v18, %v1409_v0 }
 0x2b6   : > { %v3535_v32 = vmax.f32 %v1389_v3, 0.0  ;;  %2562 = vrot.lane.b32.xlu2 %v2561_v26, %s2597_s22  ;;  %v3542_v41 = vmax.f32 %v1429_v34, 0.0  ;;  %v3589_v60 = vpop.permute.xlu1 %2547 }
 0x2b7   : > { %v3592_v2 = vpop.permute.xlu0 %2522 }
 0x2b8   : > { %1745 = vrot.lane.b32.xlu0 %v3535_v32, %s2591_s12  ;;  %v2556_v33 = vpack.i.bf16 %v3535_v32, %v3505_v44  ;;  %v2566_v39 = vpack.i.bf16 0.0, %v3542_v41  ;;  %v2571_v29 = vpack.i.bf16 %v3542_v41, %v3535_v32  ;;  %v2524_v3 = vunpack.i.l.bf16 %v3592_v2 }
 0x2ba   : > { %2557 = vrot.lane.b32.xlu1 %v2556_v33, %s2593_s18 }
 0x2be   : > { %1669 = vrot.lane.b32.xlu2 %v3535_v32, %s2592_s13  ;;  %v3598_v26 = vpop.permute.xlu1 %1445 }
 0x2bf   : > { %v3600_v34 = vpop.permute.xlu0 %2527 }
 0x2c0   : > { %2567 = vrot.lane.b32.xlu0 %v2566_v39, %s2593_s18  ;;  %v2529_v5 = vunpack.i.l.bf16 %v3600_v34 }
 0x2c2   : > { %1449 = vrot.lane.b32.xlu1 %v3519_v14, %s2598_s23 }
 0x2c6   : > { %1629 = vrot.lane.b32.xlu2 %v3535_v32, %s2594_s19 }
 0x2c8   : > { %1671 = vrot.lane.b32.xlu0 %v3542_v41, %s2592_s13 }
 0x2ca   : > { %1583 = vrot.lane.b32.xlu1 %v3535_v32, %s2595_s20 }
 0x2ce   : > { %1585 = vrot.lane.b32.xlu2 %v3542_v41, %s2595_s20 }
 0x2d0   : > { %1631 = vrot.lane.b32.xlu0 %v3542_v41, %s2594_s19 }
 0x2d2   : > { %1747 = vrot.lane.b32.xlu1 %v3542_v41, %s2591_s12 }
 0x2d6   : > { %2572 = vrot.lane.b32.xlu2 %v2571_v29, %s2597_s22 }
 0x2d8   : > { %1543 = vrot.lane.b32.xlu0 %v3535_v32, %s2596_s21 }
 0x2da   : > { %1545 = vrot.lane.b32.xlu1 %v3542_v41, %s2596_s21 }
 0x2de   : > { %1469 = vrot.lane.b32.xlu2 %v3542_v41, %s2598_s23 }
 0x2e0   : > { %1465 = vrot.lane.b32.xlu0 %v3922_v25, %s2598_s23  ;;  %v2544_v25 = vunpack.i.l.bf16 %v3583_v49 }
 0x2e2   : > { %1467 = vrot.lane.b32.xlu1 %v3535_v32, %s2598_s23 }
 0x2e6   : > { %2123 = vperm.xlu2 %2577, %v2056_v27  }
 0x2ea   : > { %2059 = vperm.xlu1 %2470, %v2056_v27  }
 0x2f0   : > { %v1564_v7 = vpop.permute.xlu2 %1563 }
 0x2f1   : > { %v3587_v54 = vsel %vm536_vm8, %v2539_v36, %v1564_v7 }
 0x2f8   : > { %v1524_v0 = vpop.permute.xlu2 %1523 }
 0x2f9   : > { %v3595_v18 = vsel %vm495_vm9, %v2544_v25, %v1524_v0 }
 0x300   : > { %v1728_v33 = vpop.permute.xlu2 %1727 }
 0x301   : > { %v1732_v39 = vsel %vm704_vm0, %v1728_v33, %v2524_v3 }
 0x302   : > { %2369 = vmatpush.msk.msra.mxu3 %vm2768_vm1, %v1732_v39  ;;  %v3613_v39 = vld [vmem:[%s3851_s5] sm:$0xff] }
 0x303   : > { %3926 = vst [vmem:[#allocation17_spill] sm:$0xff] %v3613_v39  ;;  %1895 = vmatmul.f32.vlgmr.msra.gmra.mxu2 %v3613_v39  ;;  %1935 = vmatmul.f32.vlgmr.msrb.gmra.mxu1 %v3613_v39 }
 0x308   : > { %v1650_v29 = vpop.permute.xlu1 %1649  ;;  %v1652_v58 = vpop.permute.xlu2 %1651 }
 0x309   : > { %v1726_v27 = vpop.permute.xlu0 %1725 }
 0x30a   : > { %v1731_v36 = vsel %vm704_vm0, %v1726_v27, %v1728_v33  ;;  %v1656_v33 = vsel %vm626_vm3, %v1652_v58, %v2529_v5 }
 0x30b   : > { %2351 = vmatpush.msk.msrb.mxu0 %vm2807_vm6, %v1731_v36 }
 0x310   : > { %v1610_v25 = vpop.permute.xlu1 %1609  ;;  %v2563_v23 = vpop.permute.xlu2 %2562 }
 0x311   : > { %v1448_v20 = vpop.permute.xlu0 %1447  ;;  %v2564_v56 = vunpack.i.l.bf16 %v2563_v23 }
 0x318   : > { %v2553_v4 = vpop.permute.xlu1 %2552 }
 0x319   : > { %v2555_v63 = vunpack.i.h.bf16 %v2553_v4  ;;  %v2554_v57 = vunpack.i.l.bf16 %v2553_v4  ;;  %v1566_v16 = vpop.permute.xlu0 %1565  ;;  %v2534_v4 = vunpack.i.l.bf16 %v3563_v53 }
 0x31a   : > { %v1568_v5 = vsel %vm536_vm8, %v1564_v7, %v1566_v16 }
 0x31b   : > { %v1696_v3 = vsel %vm667_vm2, %v2554_v57, %v2555_v63 }
 0x31c   : > { %1945 = vmatpush.msra.mxu3 %v1696_v3  ;;  %v2565_v3 = vunpack.i.h.bf16 %v2563_v23  ;;  %v1670_v23 = vpop.permute.xlu2 %1669 }
 0x31e   : > { %2370 = vmatpush.msk.msra.mxu3 %vm2783_vm4, %v1656_v33 }
 0x320   : > { %v1612_v27 = vpop.permute.xlu1 %1611 }
 0x321   : > { %v1616_v63 = vsel %vm585_vm5, %v1612_v27, %v2534_v4  ;;  %v1526_v36 = vpop.permute.xlu0 %1525  ;;  %v1492_v4 = vsel %vm454_vm10, %v2564_v56, %v2565_v3  ;;  %v1615_v3 = vsel %vm585_vm5, %v1610_v25, %v1612_v27  ;;  %v3928_v25 = vld [vmem:[#allocation20_spill] sm:$0xff] }
 0x322   : > { %2371 = vmatpush.msk.msra.mxu3 %vm2768_vm1, %v1616_v63  ;;  %v1528_v33 = vsel %vm495_vm9, %v1524_v0, %v1526_v36  ;;  %v1869_v63 = vld [vmem:[%s3852_s6] sm:$0xff]  ;;  %v1655_v0 = vsel %vm626_vm3, %v1650_v29, %v1652_v58  ;;  %v3655_v58 = vld [vmem:[%s3851_s5 + $0x8] sm:$0xff]  ;;  %v2549_v29 = vunpack.i.l.bf16 %v3589_v60 }
 0x323   : > { %1872 = vperm.xlu0 %2576, %v1869_v63  }
 0x324   : > { %1948 = vmatpush.msra.mxu3 %v3519_v14 }
 0x326   : > { %2372 = vmatpush.msk.msra.mxu3 %vm2783_vm4, %v1568_v5 }
 0x328   : > { %2373 = vmatpush.msk.msra.mxu3 %vm2768_vm1, %v1528_v33 }
 0x32a   : > { %v1746_v39 = vpop.permute.xlu0 %1745  ;;  %1951 = vmatpush.msra.mxu3 %v1492_v4  ;;  %v1630_v4 = vpop.permute.xlu2 %1629 }
 0x32c   : > { %v2558_v14 = vpop.permute.xlu1 %2557 }
 0x32d   : > { %v2559_v16 = vunpack.i.l.bf16 %v2558_v14 }
 0x32f   : > { %v1695_v7 = vsel %vm667_vm2, %v2559_v16, %v2554_v57  ;;  %v3927_v57 = vld [vmem:[#allocation18_spill] sm:$0xff]  ;;  %v1451_v16 = vsel %vm413_vm11, %v3598_v26, %v1448_v20  ;;  %v2560_v26 = vunpack.i.h.bf16 %v2558_v14 }
 0x330   : > { %1905 = vmatpush.msrb.mxu0 %v1695_v7 }
 0x332   : > { %2352 = vmatpush.msk.msrb.mxu0 %vm2820_vm7, %v1655_v0  ;;  %v2568_v36 = vpop.permute.xlu0 %2567 }
 0x334   : > { %v1450_v5 = vpop.permute.xlu1 %1449  ;;  %2353 = vmatpush.msk.msrb.mxu0 %vm2807_vm6, %v1615_v3 }
 0x335   : > { %v1452_v33 = vsel %vm413_vm11, %v1448_v20, %v1450_v5  ;;  %v2525_v20 = vunpack.i.h.bf16 %v3592_v2 }
 0x336   : > { %1908 = vmatpush.msrb.mxu0 %v3505_v44  ;;  %2374 = vmatpush.msk.msra.mxu3 %vm2783_vm4, %v1452_v33 }
 0x338   : > { %2354 = vmatpush.msk.msrb.mxu0 %vm2820_vm7, %v3587_v54  ;;  %2375 = vmatpush.msk.msra.mxu3 %vm2768_vm1, %v3927_v57  ;;  %v1491_v54 = vsel %vm454_vm10, %v2549_v29, %v2564_v56 }
 0x33a   : > { %2355 = vmatpush.msk.msrb.mxu0 %vm2807_vm6, %v3595_v18  ;;  %1954 = vmatpush.msra.mxu3 %v3928_v25  ;;  %v1672_v27 = vpop.permute.xlu0 %1671  ;;  %v1586_v18 = vpop.permute.xlu2 %1585 }
 0x33b   : > { %2253 = vmatmul.msk.f32.vlgmr.msra.gmra.mxu3 %vm1875_vm13, %v3655_v58  ;;  %v1675_v2 = vsel %vm626_vm3, %v1670_v23, %v1672_v27 }
 0x33c   : > { %2394 = vmatpush.msk.msrb.mxu3 %vm2783_vm4, %v3310_v61  ;;  %v1584_v63 = vpop.permute.xlu1 %1583  ;;  %1911 = vmatpush.msrb.mxu0 %v1491_v54  ;;  %v2570_v61 = vunpack.i.h.bf16 %v2568_v36 }
 0x33d   : > { %v1588_v0 = vsel %vm536_vm8, %v1584_v63, %v1586_v18  ;;  %v2047_v18 = vld [vmem:[%s3853_s7] sm:$0xff] }
 0x33e   : > { %2395 = vmatpush.msk.msrb.mxu3 %vm2768_vm1, %v3321_v42  ;;  %2356 = vmatpush.msk.msrb.mxu0 %vm2820_vm7, %v1451_v16  ;;  %v2569_v42 = vunpack.i.l.bf16 %v2568_v36  ;;  %v3937_v16 = vld [vmem:[#allocation16_spill] sm:$0xff] }
 0x340   : > { %2001 = vmatpush.msrb.mxu3 %v3036_v35  ;;  %2357 = vmatpush.msk.msrb.mxu0 %vm2807_vm6, %v3280_v59 }
 0x342   : > { %2396 = vmatpush.msk.msrb.mxu3 %vm2783_vm4, %v3337_v22  ;;  %1914 = vmatpush.msrb.mxu0 %v3332_v15  ;;  %v1632_v56 = vpop.permute.xlu0 %1631  ;;  %v2573_v14 = vpop.permute.xlu2 %2572 }
 0x343   : > { %2252 = vmatmul.msk.f32.vlgmr.msrb.gmra.mxu0 %vm1875_vm13, %v3655_v58  ;;  %v2574_v23 = vunpack.i.l.bf16 %v2573_v14 }
 0x344   : > { %2376 = vmatpush.msk.msra.mxu0 %vm2820_vm7, %v3343_v46  ;;  %2397 = vmatpush.msk.msrb.mxu3 %vm2768_vm1, %v3353_v13  ;;  %v1748_v59 = vpop.permute.xlu1 %1747  ;;  %v2530_v46 = vunpack.i.h.bf16 %v3600_v34  ;;  %v1713_v13 = vsel %vm667_vm2, %v2560_v26, %v2569_v42 }
 0x345   : > { %v1751_v22 = vsel %vm704_vm0, %v1746_v39, %v1748_v59  ;;  %v1752_v15 = vsel %vm704_vm0, %v1748_v59, %v2525_v20  ;;  %v2580_v20 = vld [vmem:[%s2670_s17 + $0x8] sm:$0xff] }
 0x346   : > { %2377 = vmatpush.msk.msra.mxu0 %vm2807_vm6, %v3361_v24  ;;  %2004 = vmatpush.msrb.mxu3 %v3370_v47  ;;  %v1714_v24 = vsel %vm667_vm2, %v2569_v42, %v2570_v61  ;;  %v2535_v47 = vunpack.i.h.bf16 %v3563_v53  ;;  %v1676_v39 = vsel %vm626_vm3, %v1672_v27, %v2530_v46  ;;  %v1635_v53 = vsel %vm585_vm5, %v1630_v4, %v1632_v56  ;;  %v2581_v61 = vld [vmem:[%s2670_s17] sm:$0xff] }
 0x347   : > { %2387 = vmatpush.msk.msrb.mxu2 %vm2807_vm6, %v1751_v22  ;;  %2405 = vmatpush.msk.msra.mxu1 %vm2768_vm1, %v1752_v15 }
 0x348   : > { %1961 = vmatpush.msra.mxu0 %v3045_v45  ;;  %2398 = vmatpush.msk.msrb.mxu3 %vm2783_vm4, %v3376_v6  ;;  %v1636_v34 = vsel %vm585_vm5, %v1632_v56, %v2535_v47  ;;  %v3939_v56 = vld [vmem:[#allocation15_spill] sm:$0xff] }
 0x349   : > { %1985 = vmatpush.msrb.mxu2 %v1713_v13  ;;  %2025 = vmatpush.msra.mxu1 %v1714_v24 }
 0x34a   : > { %2378 = vmatpush.msk.msra.mxu0 %vm2820_vm7, %v3382_v17  ;;  %2399 = vmatpush.msk.msrb.mxu3 %vm2768_vm1, %v2835_v50  ;;  %v1544_v6 = vpop.permute.xlu0 %1543  ;;  %v2540_v50 = vunpack.i.h.bf16 %v3572_v55 }
 0x34b   : > { %2388 = vmatpush.msk.msrb.mxu2 %vm2820_vm7, %v1675_v2  ;;  %2406 = vmatpush.msk.msra.mxu1 %vm2783_vm4, %v1676_v39  ;;  %v2107_v39 = vld [vmem:[%s2670_s17 + $0x8] sm:$0xff] }
 0x34c   : > { %2379 = vmatpush.msk.msra.mxu0 %vm2807_vm6, %v3393_v9  ;;  %2007 = vmatpush.msrb.mxu3 %v2878_v10  ;;  %v1546_v17 = vpop.permute.xlu1 %1545  ;;  %v2545_v9 = vunpack.i.h.bf16 %v3583_v49  ;;  %v2575_v10 = vunpack.i.h.bf16 %v2573_v14  ;;  %v1587_v7 = vsel %vm536_vm8, %v2540_v50, %v1584_v63  ;;  %v1470_v49 = vpop.permute.xlu2 %1469 }
 0x34d   : > { %2389 = vmatpush.msk.msrb.mxu2 %vm2807_vm6, %v1635_v53  ;;  %2407 = vmatpush.msk.msra.mxu1 %vm2768_vm1, %v1636_v34  ;;  %v1548_v55 = vsel %vm495_vm9, %v1544_v6, %v1546_v17 }
 0x34e   : > { %1964 = vmatpush.msra.mxu0 %v3403_v62  ;;  %2400 = vmatpush.msk.msrb.mxu3 %vm2783_vm4, %v2883_v11  ;;  %v2550_v11 = vunpack.i.h.bf16 %v3589_v60  ;;  %v1547_v62 = vsel %vm495_vm9, %v2545_v9, %v1544_v6  ;;  %v1510_v60 = vsel %vm454_vm10, %v2574_v23, %v2575_v10 }
 0x34f   : > { %1988 = vmatpush.msrb.mxu2 %v3535_v32  ;;  %2028 = vmatpush.msra.mxu1 %v3542_v41 }
 0x350   : > { %2380 = vmatpush.msk.msra.mxu0 %vm2820_vm7, %v3408_v1  ;;  %2401 = vmatpush.msk.msrb.mxu3 %vm2768_vm1, %v2909_v21  ;;  %v3759_v1 = vld [vmem:[%s2670_s17 + $0x18] sm:$0xff] }
 0x351   : > { %2390 = vmatpush.msk.msrb.mxu2 %vm2820_vm7, %v1587_v7  ;;  %2408 = vmatpush.msk.msra.mxu1 %vm2783_vm4, %v1588_v0 }
 0x352   : > { %2381 = vmatpush.msk.msra.mxu0 %vm2807_vm6, %v2844_v51  ;;  %2010 = vmatpush.msrb.mxu3 %v3759_v1  ;;  %v1466_v21 = vpop.permute.xlu0 %1465  ;;  %v1509_v51 = vsel %vm454_vm10, %v2550_v11, %v2574_v23 }
 0x353   : > { %2391 = vmatpush.msk.msrb.mxu2 %vm2807_vm6, %v1547_v62  ;;  %2409 = vmatpush.msk.msra.mxu1 %vm2768_vm1, %v1548_v55 }
 0x354   : > { %1967 = vmatpush.msra.mxu0 %v2875_v8  ;;  %2402 = vmatpush.msk.msrb.mxu3 %vm2783_vm4, %v2922_v30  ;;  %v1468_v36 = vpop.permute.xlu1 %1467  ;;  %v2579_v8 = vld [vmem:[%s2670_s17 + $0x10] sm:$0xff]  ;;  %v3929_v30 = vld [vmem:[#allocation9_spill] sm:$0xff]  ;;  %v2124_v34 = vpop.permute.xlu2 %2123 }
 0x355   : > { %1991 = vmatpush.msrb.mxu2 %v1509_v51  ;;  %2031 = vmatpush.msra.mxu1 %v1510_v60  ;;  %v1471_v3 = vsel %vm413_vm11, %v1466_v21, %v1468_v36  ;;  %v1472_v5 = vsel %vm413_vm11, %v1468_v36, %v1470_v49 }
 0x356   : > { %2382 = vmatpush.msk.msra.mxu0 %vm2820_vm7, %v2940_v38  ;;  %2403 = vmatpush.msk.msrb.mxu3 %vm2768_vm1, %v2957_v48  ;;  %v3930_v38 = vld [vmem:[#allocation22_spill] sm:$0xff]  ;;  %v3931_v48 = vld [vmem:[#allocation17_spill] sm:$0xff] }
 0x357   : > { %2392 = vmatpush.msk.msrb.mxu2 %vm2820_vm7, %v1471_v3  ;;  %2410 = vmatpush.msk.msra.mxu1 %vm2783_vm4, %v1472_v5 }
 0x358   : > { %2383 = vmatpush.msk.msra.mxu0 %vm2807_vm6, %v2950_v40  ;;  %2013 = vmatpush.msrb.mxu3 %v2960_v52  ;;  %v3932_v40 = vld [vmem:[#allocation23_spill] sm:$0xff]  ;;  %v3933_v52 = vld [vmem:[#allocation10_spill] sm:$0xff] }
 0x359   : > { %2393 = vmatpush.msk.msrb.mxu2 %vm2807_vm6, %v3289_v12  ;;  %2411 = vmatpush.msk.msra.mxu1 %vm2768_vm1, %v3292_v31  ;;  %v3936_v12 = vld [vmem:[#allocation13_spill] sm:$0xff] }
 0x35a   : > { %1970 = vmatpush.msra.mxu0 %v2579_v8  ;;  %2404 = vmatpush.msk.msrb.mxu3 %vm2783_vm4, %v3929_v30 }
 0x35b   : > { %1994 = vmatpush.msrb.mxu2 %v3930_v38  ;;  %2015 = vmatmul.f32.vlgmr.msrb.gmra.mxu3 %v3931_v48 }
 0x35c   : > { %2034 = vmatpush.msra.mxu1 %v3932_v40  ;;  %2384 = vmatpush.msk.msra.mxu0 %vm2820_vm7, %v3933_v52  ;;  %v2060_v14 = vpop.permute.xlu1 %2059 }
 0x35d   : > { %2254 = vmatmul.msk.f32.vlgmr.msrb.gmra.mxu2 %vm1875_vm13, %v3655_v58  ;;  %2255 = vmatmul.msk.f32.vlgmr.msra.gmra.mxu1 %vm1875_vm13, %v3655_v58 }
 0x35e   : > { %2385 = vmatpush.msk.msra.mxu0 %vm2807_vm6, %v3934_v19 }
 0x360   : > { %1973 = vmatpush.msra.mxu0 %v3935_v28 }
 0x362   : > { %2386 = vmatpush.msk.msra.mxu0 %vm2820_vm7, %v3936_v12 }
 0x363   : > { %1975 = vmatmul.f32.vlgmr.msra.gmra.mxu0 %v3931_v48 }
 0x380   : > { %v1936_v31 = vpop.f32.mrf.mxu1 }
 0x386   : > { %v1896_v4 = vpop.f32.mrf.mxu2 }
 0x395   : > { %v1873_v33 = vpop.permute.xlu0 %1872 }
 0x396   : > { %v1937_v57 = vadd.f32 %v1936_v31, %v1873_v33  ;;  %v1897_v29 = vadd.f32 %v1896_v4, %v1873_v33 }
 0x3be   : > { %v1956_v25 = vpop.f32.mrf.mxu3 }
 0x3bf   : > { %v1957_v58 = vadd.f32 %v1956_v25, %v1937_v57 }
 0x3c0   : > { %v1916_v27 = vpop.f32.mrf.mxu0 }
 0x3c1   : > { %v2040_v37 = vmax.f32 %v1957_v58, 0.0  ;;  %v1917_v54 = vadd.f32 %v1916_v27, %v1897_v29 }
 0x3c3   : > { %v2039_v63 = vmax.f32 %v1917_v54, 0.0  ;;  %2098 = vmatpush.msrb.mxu0 %v2040_v37 }
 0x3c5   : > { %2078 = vmatpush.msra.mxu2 %v2039_v63  ;;  %2099 = vmatpush.msrb.mxu0 %v3937_v16 }
 0x3c7   : > { %2079 = vmatpush.msra.mxu2 %v3505_v44  ;;  %2100 = vmatpush.msrb.mxu0 %v3938_v43 }
 0x3c9   : > { %2080 = vmatpush.msra.mxu2 %v3939_v56  ;;  %2101 = vmatpush.msrb.mxu0 %v2580_v20 }
 0x3ca   : > { %2257 = vmatmul.msk.f32.vlgmr.msrb.gmra.mxu0 %vm2062_vm14, %v2047_v18 }
 0x3cb   : > { %2081 = vmatpush.msra.mxu2 %v2581_v61 }
 0x3cc   : > { %2256 = vmatmul.msk.f32.vlgmr.msra.gmra.mxu2 %vm2062_vm14, %v2047_v18 }
 0x3da   : > { %v2036_v59 = vpop.f32.mrf.mxu1 }
 0x3de   : > { %v2016_v42 = vpop.f32.mrf.mxu3 }
 0x3df   : > { %v2017_v44 = vadd.f32 %v2016_v42, %v1873_v33 }
 0x3e0   : > { %v1976_v22 = vpop.f32.mrf.mxu0  ;;  %v1996_v15 = vpop.f32.mrf.mxu2 }
 0x3e1   : > { %v1977_v26 = vadd.f32 %v1976_v22, %v1873_v33  ;;  %v2037_v46 = vadd.f32 %v2036_v59, %v2017_v44 }
 0x3e3   : > { %v2042_v13 = vmax.f32 %v2037_v46, 0.0  ;;  %v1997_v24 = vadd.f32 %v1996_v15, %v1977_v26 }
 0x3e5   : > { %v2041_v47 = vmax.f32 %v1997_v24, 0.0  ;;  %2158 = vmatpush.msrb.mxu2 %v2042_v13 }
 0x3e7   : > { %2138 = vmatpush.msrb.mxu1 %v2041_v47  ;;  %2159 = vmatpush.msrb.mxu2 %v3542_v41 }
 0x3e9   : > { %2139 = vmatpush.msrb.mxu1 %v3535_v32  ;;  %2160 = vmatpush.msrb.mxu2 %v3036_v35 }
 0x3eb   : > { %2140 = vmatpush.msrb.mxu1 %v3045_v45  ;;  %2161 = vmatpush.msrb.mxu2 %v3759_v1 }
 0x3ec   : > { %2259 = vmatmul.msk.f32.vlgmr.msrb.gmra.mxu2 %vm2062_vm14, %v2047_v18 }
 0x3ed   : > { %2141 = vmatpush.msrb.mxu1 %v2579_v8 }
 0x3ee   : > { %2258 = vmatmul.msk.f32.vlgmr.msrb.gmra.mxu1 %vm2062_vm14, %v2047_v18 }
 0x447   : > { %v2103_v2 = vpop.f32.mrf.mxu0 }
 0x448   : > { %v2104_v6 = vadd.f32 %v2103_v2, %v2060_v14 }
 0x44a   : > { %v2109_v35 = vadd.f32 %v2107_v39, %v2104_v6 }
 0x44c   : > { %2111 = vst [vmem:[%s339_s29 + $0x8] sm:$0xff] %v2109_v35 }
 0x44f   : > { %v2083_v45 = vpop.f32.mrf.mxu2 }
 0x450   : > { %v2084_v41 = vadd.f32 %v2083_v45, %v2060_v14 }
 0x453   : > { %v2106_v32 = vld [vmem:[%s2670_s17] sm:$0xff] }
 0x454   : > { %v2108_v53 = vadd.f32 %v2106_v32, %v2084_v41 }
 0x456   : > { %2110 = vst [vmem:[%s339_s29] sm:$0xff] %v2108_v53 }
 0x45d   : > { %v2260_v9 = vld [vmem:[%s2670_s17 + $0x10] sm:$0xff] }
 0x46b   : > { %v2143_v17 = vpop.f32.mrf.mxu1 }
 0x46c   : > { %v2144_v50 = vadd.f32 %v2143_v17, %v2124_v34 }
 0x46e   : > { %v2168_v10 = vadd.f32 %v2260_v9, %v2144_v50 }
 0x46f   : > { %v2163_v23 = vpop.f32.mrf.mxu2 }
 0x470   : > { %2262 = vst [vmem:[%s339_s29 + $0x10] sm:$0xff] %v2168_v10  ;;  %v2164_v7 = vadd.f32 %v2163_v23, %v2124_v34 }
 0x477   : > { %v2261_v0 = vld [vmem:[%s2670_s17 + $0x18] sm:$0xff] }
 0x478   : > { %v2169_v11 = vadd.f32 %v2261_v0, %v2164_v7 }
 0x47a   : > { %2263 = vst [vmem:[%s339_s29 + $0x18] sm:$0xff] %v2169_v11 }
 0x47b PF: > { %s19_s30 = sadd.s32 1, %s2588_s30  }
 0x47c   : > { %p16_p4 = scmp.ge.s32.totalorder %s19_s30, 4  }
 0x47e   :  { %18 = sbr.rel (!%p16_p4) target bundleno = 1 (0x1), region = 88 }

</bundles_post_ra>
